<compile_context>
chip_gen: v7x
topology: tpu7x:2x2x1
jax: 0.10.0
libtpu: 0.0.40
codegen_flags: <defaults>
</compile_context>

<pallas_src>
import functools
import math

import jax
import jax.numpy as jnp
import numpy as np
from jax.experimental import pallas as pl
from jax.experimental.pallas import tpu as pltpu

NEG_INF = -1e30


# ----------------------------------------------------------------------------- #
# helpers usable inside kernels
# ----------------------------------------------------------------------------- #
def _erf(x):
    # Abramowitz & Stegun 7.1.26 polynomial erf (max abs error ~1.5e-7).
    a1, a2, a3, a4, a5 = 0.254829592, -0.284496736, 1.421413741, -1.453152027, 1.061405429
    p = 0.3275911
    ax = jnp.abs(x)
    t = 1.0 / (1.0 + p * ax)
    poly = ((((a5 * t + a4) * t + a3) * t + a2) * t + a1) * t
    y = 1.0 - poly * jnp.exp(-ax * ax)
    return jnp.where(x < 0, -y, y)


def _gelu_exact(x):
    # matches PyTorch F.gelu (erf-based "exact" gelu)
    return 0.5 * x * (1.0 + _erf(x * 0.7071067811865476))


def _layer_norm(x, w, b, eps=1e-5):
    mean = jnp.mean(x, axis=-1, keepdims=True)
    c = x - mean
    var = jnp.mean(c * c, axis=-1, keepdims=True)
    return c * jax.lax.rsqrt(var + eps) * w + b


# ----------------------------------------------------------------------------- #
# Fused kernel: embedding + transformer encoder + heads, one branch per step
# ----------------------------------------------------------------------------- #
_ENC_PARAM_ORDER = [
    "wp_pad", "bp_pad", "wc_pad", "bc_pad",
    "ln1w", "ln1b", "wqkv", "bqkv", "wo", "bo",
    "ln2w", "ln2b", "w1", "b1", "w2", "b2", "lnfw", "lnfb",
]


def _fused_kernel(player_ref, cards_ref, pmask_ref, cmask_ref,
                  wp_ref, bp_ref, wc_ref, bc_ref,
                  ln1w_ref, ln1b_ref, wqkv_ref, bqkv_ref, wo_ref, bo_ref,
                  ln2w_ref, ln2b_ref, w1_ref, b1_ref, w2_ref, b2_ref,
                  lnfw_ref, lnfb_ref,
                  wpp_ref, bpp_ref, wcppos_ref, bcppos_ref, wval_ref, bval_ref,
                  full_ref, pslab_ref, cslab_ref,
                  *, B, C, num_layers, num_heads, NP, NA, HL):
    S = C + 1
    BC = B * C
    W = wp_ref.shape[-1]
    dh = W // num_heads
    scale = 1.0 / math.sqrt(dh)

    # ----- input embedding (whole batch, one matmul per input kind) --------- #
    # pad column (F.pad value=1/0) is folded into the weights / biases.
    prow = jnp.dot(player_ref[...], wp_ref[0], preferred_element_type=jnp.float32) + bp_ref[0]   # (B, W)
    crow = jnp.dot(cards_ref[...], wc_ref[0], preferred_element_type=jnp.float32) + bc_ref[0]    # (B*C, W)
    # interleave into (B*S, W): rows [b*S] = player token b, [b*S+1 .. ] = cards.
    # NOTE: static unroll over B (fine for small demo batches).
    pieces = []
    for b in range(B):
        pieces.append(prow[b:b + 1, :])
        pieces.append(crow[b * C:(b + 1) * C, :])
    x = jnp.concatenate(pieces, axis=0)                                   # (B*S, W)

    # ----- transformer encoder stack (pre-norm layers + final LayerNorm) ---- #
    for l in range(num_layers):
        h = _layer_norm(x, ln1w_ref[0, l], ln1b_ref[0, l])
        qkv = jnp.dot(h, wqkv_ref[0, l], preferred_element_type=jnp.float32) + bqkv_ref[0, l]     # (B*S, 3W)
        q, k, v = qkv[:, 0:W], qkv[:, W:2 * W], qkv[:, 2 * W:3 * W]
        attn_rows = []
        for b in range(B):
            rs = slice(b * S, (b + 1) * S)
            qb, kb, vb = q[rs], k[rs], v[rs]
            head_outs = []
            for hd in range(num_heads):
                cs = slice(hd * dh, (hd + 1) * dh)
                s = jax.lax.dot_general(qb[:, cs], kb[:, cs], (((1,), (1,)), ((), ())),
                                        preferred_element_type=jnp.float32) * scale   # (S, S)
                s = s - jnp.max(s, axis=-1, keepdims=True)
                e = jnp.exp(s)
                p = e * pl.reciprocal(jnp.sum(e, axis=-1, keepdims=True), approx=True)
                head_outs.append(jnp.dot(p, vb[:, cs], preferred_element_type=jnp.float32))
            attn_rows.append(jnp.concatenate(head_outs, axis=-1))          # (S, W)
        attn = jnp.concatenate(attn_rows, axis=0)                          # (B*S, W)
        # single output projection over all rows
        x = x + jnp.dot(attn, wo_ref[0, l], preferred_element_type=jnp.float32) + bo_ref[0, l]
        # feed-forward (pre-norm)
        h = _layer_norm(x, ln2w_ref[0, l], ln2b_ref[0, l])
        ff = _gelu_exact(jnp.dot(h, w1_ref[0, l], preferred_element_type=jnp.float32) + b1_ref[0, l])
        x = x + jnp.dot(ff, w2_ref[0, l], preferred_element_type=jnp.float32) + b2_ref[0, l]

    x = _layer_norm(x, lnfw_ref[0], lnfb_ref[0])
    full_ref[0] = x                                                        # (B*S, W)

    # ----- heads: branch 0 = policy / card / position, branch 1 = value ----- #
    enc_p = jnp.concatenate([x[b * S:b * S + 1, :] for b in range(B)], axis=0)        # (B, W)
    enc_c = jnp.concatenate([x[b * S + 1:(b + 1) * S, :] for b in range(B)], axis=0)  # (B*C, W)
    is_policy = pl.program_id(0) == 0

    @pl.when(is_policy)
    def _():
        pp = jnp.dot(enc_p, wpp_ref[...], preferred_element_type=jnp.float32) + bpp_ref[...]
        pp = jnp.where(pmask_ref[...] != 0, pp, NEG_INF)                   # (B, NP)
        chead = jnp.dot(enc_c, wcppos_ref[...], preferred_element_type=jnp.float32) + bcppos_ref[...]
        cp = jnp.where(cmask_ref[...] != 0, chead[:, 0:NA], NEG_INF)       # (B*C, NA)
        pos = chead[:, NA:NA + 1]                                          # (B*C, 1)
        # joint log_softmax over cat(player_logits, card_logits) per batch row
        pp_rows, cp_rows = [], []
        for b in range(B):
            pp_b = pp[b:b + 1, :]
            cp_b = cp[b * C:(b + 1) * C, :]
            m = jnp.maximum(jnp.max(pp_b), jnp.max(cp_b))
            denom = jnp.sum(jnp.exp(pp_b - m)) + jnp.sum(jnp.exp(cp_b - m))
            logz = m + jnp.log(denom)
            pp_rows.append(pp_b - logz)
            cp_rows.append(cp_b - logz)
        pp_lp = jnp.concatenate(pp_rows, axis=0)                            # (B, NP)
        cp_lp = jnp.concatenate(cp_rows, axis=0)                            # (B*C, NA)
        # lane-dense 128-wide packed slabs -> single unmasked stores
        pslab_ref[0] = jnp.concatenate(
            [pp_lp, jnp.zeros((B, HL - NP), jnp.float32)], axis=-1)
        cslab_ref[0] = jnp.concatenate(
            [cp_lp, pos, jnp.zeros((BC, HL - NA - 1), jnp.float32)], axis=-1)

    @pl.when(jnp.logical_not(is_policy))
    def _():
        val = jnp.dot(enc_p, wval_ref[...], preferred_element_type=jnp.float32) + bval_ref[...]  # (B, 1)
        pslab_ref[0] = jnp.concatenate(
            [val, jnp.zeros((B, HL - 1), jnp.float32)], axis=-1)
        cslab_ref[0] = jnp.zeros((BC, HL), jnp.float32)


# ----------------------------------------------------------------------------- #
# Full forward (single pallas_call)
# ----------------------------------------------------------------------------- #
def hearthstone_forward(player, cards, pmask, cmask, policy_params, value_params,
                        head_params, num_heads):
    B, _ = player.shape
    C, D = cards.shape[1], cards.shape[2]
    S = C + 1
    W = policy_params["wp_pad"].shape[-1]
    L = policy_params["wqkv"].shape[0]
    NP = head_params["wpp"].shape[1]
    NA = head_params["wcp"].shape[1]
    HL = 128  # lane-dense head-output slab width

    cards2d = cards.reshape(B * C, D)
    pmask_i = pmask.astype(jnp.int32)                      # (B, NP)
    cmask2d = cmask.astype(jnp.int32).reshape(B * C, NA)   # (B*C, NA)

    # branch-stacked encoder params (branch 0 = policy, branch 1 = value)
    enc_stacked = [jnp.stack([policy_params[k], value_params[k]], axis=0)
                   for k in _ENC_PARAM_ORDER]

    # card-policy and card-position heads fused into one (W, NA+1) projection
    wcppos = jnp.concatenate([head_params["wcp"], head_params["wpos"]], axis=1)
    bcppos = jnp.concatenate([head_params["bcp"], jnp.zeros((1, 1), jnp.float32)], axis=1)
    head_args = [head_params["wpp"], head_params["bpp"], wcppos, bcppos,
                 head_params["wval"], head_params["bval"]]
    data_args = [player, cards2d, pmask_i, cmask2d]

    def _const_spec(a):
        nd = a.ndim
        return pl.BlockSpec(a.shape, lambda br, _nd=nd: (0,) * _nd)

    def _branch_spec(shape):
        nd = len(shape)
        return pl.BlockSpec((1,) + tuple(shape[1:]),
                            lambda br, _nd=nd: (br,) + (0,) * (_nd - 1))

    in_specs = ([_const_spec(a) for a in data_args]
                + [_branch_spec(a.shape) for a in enc_stacked]
                + [_const_spec(a) for a in head_args])

    out_shapes = (
        jax.ShapeDtypeStruct((2, B * S, W), jnp.float32),   # encoder outputs
        jax.ShapeDtypeStruct((2, B, HL), jnp.float32),      # player slab (policy lp | value)
        jax.ShapeDtypeStruct((2, B * C, HL), jnp.float32),  # card slab (card lp | pos)
    )
    out_specs = (
        _branch_spec((2, B * S, W)),
        _branch_spec((2, B, HL)),
        _branch_spec((2, B * C, HL)),
    )

    # explicit scoped-VMEM limit, computed from the operand footprint
    total_bytes = sum(int(np.prod(a.shape)) * a.dtype.itemsize
                      for a in data_args + enc_stacked + head_args)
    total_bytes += sum(int(np.prod(s.shape)) * 4 for s in out_shapes)
    vmem_limit = int(min(max(4 * total_bytes, 16 * 1024 * 1024), 48 * 1024 * 1024))

    full, pslab, cslab = pl.pallas_call(
        functools.partial(_fused_kernel, B=B, C=C, num_layers=L,
                          num_heads=num_heads, NP=NP, NA=NA, HL=HL),
        out_shape=out_shapes,
        grid=(2,),
        in_specs=in_specs,
        out_specs=out_specs,
        compiler_params=pltpu.CompilerParams(
            dimension_semantics=("parallel",),
            vmem_limit_bytes=vmem_limit),
    )(*data_args, *enc_stacked, *head_args)

    # cheap JAX-side unpacking of the lane-dense slabs
    pol_full = full[0].reshape(B, S, W)
    val_full = full[1].reshape(B, S, W)
    card_block = cslab[0].reshape(B, C, HL)
    policy = jnp.concatenate(
        [pslab[0, :, :NP], card_block[:, :, :NA].reshape(B, C * NA)], axis=1)
    value = pslab[1, :, 0]
    card_position_scores = card_block[:, :, NA]
    return policy, value, card_position_scores, pol_full, val_full


# ----------------------------------------------------------------------------- #
# Parameter construction (mirrors module __init__ shapes; QKV pre-fused)
# ----------------------------------------------------------------------------- #
def make_encoder_params(key, P, D, W, L, F):
    state = {"key": key}

    def nk():
        state["key"], sub = jax.random.split(state["key"])
        return sub

    def xav(shape):  # stored as (in, out)
        a = math.sqrt(6.0 / (shape[0] + shape[1]))
        return jax.random.uniform(nk(), shape, jnp.float32, -a, a)

    def unif(shape, s=0.05):
        return jax.random.uniform(nk(), shape, jnp.float32, -s, s)

    # fc_player: Linear(P -> W-1), fc_cards: Linear(D -> W-1); pad column folded in.
    wp = xav((P, W - 1)); bp = unif((W - 1,))
    wc = xav((D, W - 1)); bc = unif((W - 1,))
    p = {
        "wp_pad": jnp.concatenate([jnp.zeros((P, 1), jnp.float32), wp], axis=1),
        "bp_pad": jnp.concatenate([jnp.ones((1,), jnp.float32), bp])[None, :],
        "wc_pad": jnp.concatenate([jnp.zeros((D, 1), jnp.float32), wc], axis=1),
        "bc_pad": jnp.concatenate([jnp.zeros((1,), jnp.float32), bc])[None, :],
    }

    def per_layer(fn):
        return jnp.stack([fn() for _ in range(L)], axis=0)

    p["ln1w"] = jnp.ones((L, 1, W), jnp.float32); p["ln1b"] = jnp.zeros((L, 1, W), jnp.float32)
    p["ln2w"] = jnp.ones((L, 1, W), jnp.float32); p["ln2b"] = jnp.zeros((L, 1, W), jnp.float32)
    # fused QKV projection: (W, 3W) weight + (1, 3W) bias per layer ([q | k | v])
    p["wqkv"] = per_layer(lambda: jnp.concatenate([xav((W, W)) for _ in range(3)], axis=1))
    p["bqkv"] = per_layer(lambda: jnp.concatenate([unif((1, W)) for _ in range(3)], axis=1))
    p["wo"] = per_layer(lambda: xav((W, W))); p["bo"] = per_layer(lambda: unif((1, W)))
    p["w1"] = per_layer(lambda: xav((W, F))); p["b1"] = per_layer(lambda: unif((1, F)))
    p["w2"] = per_layer(lambda: xav((F, W))); p["b2"] = per_layer(lambda: unif((1, W)))
    p["lnfw"] = jnp.ones((1, W), jnp.float32); p["lnfb"] = jnp.zeros((1, W), jnp.float32)
    return p


def make_head_params(key, W, NP, NA):
    ks = jax.random.split(key, 7)

    def xav(k, shape):
        a = math.sqrt(6.0 / (shape[0] + shape[1]))
        return jax.random.uniform(k, shape, jnp.float32, -a, a)

    # NOTE: HearthstoneTransformerNet.__init__ zero-initializes the policy /
    # card-policy / card-position heads; small random weights are used here so
    # the numeric check exercises those matmul paths (the kernel is init-agnostic).
    return {
        "wpp": xav(ks[0], (W, NP)),
        "bpp": jax.random.uniform(ks[1], (1, NP), jnp.float32, -0.05, 0.05),
        "wcp": xav(ks[2], (W, NA)),
        "bcp": jax.random.uniform(ks[3], (1, NA), jnp.float32, -0.05, 0.05),
        "wpos": xav(ks[4], (W, 1)),
        "wval": xav(ks[5], (W, 1)),
        "bval": jax.random.uniform(ks[6], (1, 1), jnp.float32, -0.05, 0.05),
    }


# ----------------------------------------------------------------------------- #
# Pure-JAX reference (mirrors the PyTorch forward) for correctness checking
# ----------------------------------------------------------------------------- #
def _ref_ln(x, w, b, eps=1e-5):
    mean = x.mean(-1, keepdims=True)
    var = ((x - mean) ** 2).mean(-1, keepdims=True)
    return (x - mean) / jnp.sqrt(var + eps) * w + b


def ref_encoder(player, cards, ep, H):
    pr = player @ ep["wp_pad"][:, 1:] + ep["bp_pad"][0, 1:]
    pr = jnp.pad(pr[:, None, :], ((0, 0), (0, 0), (1, 0)), constant_values=1.0)
    cr = cards @ ep["wc_pad"][:, 1:] + ep["bc_pad"][0, 1:]
    cr = jnp.pad(cr, ((0, 0), (0, 0), (1, 0)), constant_values=0.0)
    x = jnp.concatenate([pr, cr], axis=1)                      # (B, S, W)
    B, S, W = x.shape
    dh = W // H
    L = ep["wqkv"].shape[0]
    for l in range(L):
        h = _ref_ln(x, ep["ln1w"][l], ep["ln1b"][l])
        wq, wk, wv = (ep["wqkv"][l][:, :W], ep["wqkv"][l][:, W:2 * W], ep["wqkv"][l][:, 2 * W:])
        bq, bk, bv = (ep["bqkv"][l][:, :W], ep["bqkv"][l][:, W:2 * W], ep["bqkv"][l][:, 2 * W:])
        q = (h @ wq + bq).reshape(B, S, H, dh).transpose(0, 2, 1, 3)
        k = (h @ wk + bk).reshape(B, S, H, dh).transpose(0, 2, 1, 3)
        v = (h @ wv + bv).reshape(B, S, H, dh).transpose(0, 2, 1, 3)
        s = jnp.einsum("bhqd,bhkd->bhqk", q, k) / math.sqrt(dh)
        p = jax.nn.softmax(s, axis=-1)
        o = jnp.einsum("bhqk,bhkd->bhqd", p, v).transpose(0, 2, 1, 3).reshape(B, S, W)
        x = x + o @ ep["wo"][l] + ep["bo"][l]
        h = _ref_ln(x, ep["ln2w"][l], ep["ln2b"][l])
        ff = jax.nn.gelu(h @ ep["w1"][l] + ep["b1"][l], approximate=False)
        x = x + ff @ ep["w2"][l] + ep["b2"][l]
    return _ref_ln(x, ep["lnfw"], ep["lnfb"])


def ref_heads(pol_full, val_full, pmask, cmask, hp):
    B = pol_full.shape[0]
    pol_player, pol_cards = pol_full[:, 0], pol_full[:, 1:]
    val_player = val_full[:, 0]
    pp = jnp.where(pmask, pol_player @ hp["wpp"] + hp["bpp"][0], -1e30)
    cp = jnp.where(cmask, pol_cards @ hp["wcp"] + hp["bcp"][0], -1e30)
    flat = jnp.concatenate([pp.reshape(B, -1), cp.reshape(B, -1)], axis=1)
    policy = jax.nn.log_softmax(flat, axis=1)
    value = (val_player @ hp["wval"] + hp["bval"][0])[:, 0]
    pos = (pol_cards @ hp["wpos"])[..., 0]
    return policy, value, pos


# ----------------------------------------------------------------------------- #
# main
# ----------------------------------------------------------------------------- #
if __name__ == "__main__":
    # small shapes consistent with the module's forward (S = 1 + C = 8)
    B, P, C, D = 2, 20, 7, 24          # batch, player feat dim, num cards, card feat dim
    W, L, H = 16, 1, 4                 # hidden_size, hidden_layers, nhead
    FF = 4 * W                         # dim_feedforward = width * 4
    NP, NA = 5, 3                      # player_action_set size, card_action_set[1] size

    root = jax.random.PRNGKey(0)
    k_in, k_pol, k_val, k_head = jax.random.split(root, 4)
    k1, k2, k3, k4 = jax.random.split(k_in, 4)
    player = jax.random.normal(k1, (B, P), jnp.float32)
    cards = jax.random.normal(k2, (B, C, D), jnp.float32)
    pmask = jax.random.bernoulli(k3, 0.75, (B, NP))       # valid_actions.player_action_tensor
    cmask = jax.random.bernoulli(k4, 0.75, (B, C, NA))    # valid_actions.card_action_tensor

    policy_params = make_encoder_params(k_pol, P, D, W, L, FF)
    value_params = make_encoder_params(k_val, P, D, W, L, FF)
    head_params = make_head_params(k_head, W, NP, NA)

    policy, value, card_pos, pol_full, val_full = hearthstone_forward(
        player, cards, pmask, cmask, policy_params, value_params, head_params, H)
    jax.block_until_ready((policy, value, card_pos, pol_full, val_full))

    # reference check (plain JAX, mirrors the PyTorch forward semantics)
    ref_pol_full = ref_encoder(player, cards, policy_params, H)
    ref_val_full = ref_encoder(player, cards, value_params, H)
    ref_policy, ref_value, ref_pos = ref_heads(ref_pol_full, ref_val_full, pmask, cmask, head_params)

    np.testing.assert_allclose(np.asarray(pol_full), np.asarray(ref_pol_full), rtol=5e-3, atol=5e-3)
    np.testing.assert_allclose(np.asarray(val_full), np.asarray(ref_val_full), rtol=5e-3, atol=5e-3)
    np.testing.assert_allclose(np.asarray(policy), np.asarray(ref_policy), rtol=5e-3, atol=5e-3)
    np.testing.assert_allclose(np.asarray(value), np.asarray(ref_value), rtol=5e-3, atol=5e-3)
    np.testing.assert_allclose(np.asarray(card_pos), np.asarray(ref_pos), rtol=5e-3, atol=5e-3)

    print("KERNEL_OK")
</pallas_src>

<mosaic_0001>
module attributes {stable_mosaic.version = 11 : i64} {
  func.func @_fused_kernel(%arg0: i32, %arg1: memref<2x20xf32, #tpu.memory_space<vmem>>, %arg2: memref<14x24xf32, #tpu.memory_space<vmem>>, %arg3: memref<2x5xi32, #tpu.memory_space<vmem>>, %arg4: memref<14x3xi32, #tpu.memory_space<vmem>>, %arg5: memref<1x20x16xf32, #tpu.memory_space<vmem>>, %arg6: memref<1x1x16xf32, #tpu.memory_space<vmem>>, %arg7: memref<1x24x16xf32, #tpu.memory_space<vmem>>, %arg8: memref<1x1x16xf32, #tpu.memory_space<vmem>>, %arg9: memref<1x1x1x16xf32, #tpu.memory_space<vmem>>, %arg10: memref<1x1x1x16xf32, #tpu.memory_space<vmem>>, %arg11: memref<1x1x16x48xf32, #tpu.memory_space<vmem>>, %arg12: memref<1x1x1x48xf32, #tpu.memory_space<vmem>>, %arg13: memref<1x1x16x16xf32, #tpu.memory_space<vmem>>, %arg14: memref<1x1x1x16xf32, #tpu.memory_space<vmem>>, %arg15: memref<1x1x1x16xf32, #tpu.memory_space<vmem>>, %arg16: memref<1x1x1x16xf32, #tpu.memory_space<vmem>>, %arg17: memref<1x1x16x64xf32, #tpu.memory_space<vmem>>, %arg18: memref<1x1x1x64xf32, #tpu.memory_space<vmem>>, %arg19: memref<1x1x64x16xf32, #tpu.memory_space<vmem>>, %arg20: memref<1x1x1x16xf32, #tpu.memory_space<vmem>>, %arg21: memref<1x1x16xf32, #tpu.memory_space<vmem>>, %arg22: memref<1x1x16xf32, #tpu.memory_space<vmem>>, %arg23: memref<16x5xf32, #tpu.memory_space<vmem>>, %arg24: memref<1x5xf32, #tpu.memory_space<vmem>>, %arg25: memref<16x4xf32, #tpu.memory_space<vmem>>, %arg26: memref<1x4xf32, #tpu.memory_space<vmem>>, %arg27: memref<16x1xf32, #tpu.memory_space<vmem>>, %arg28: memref<1x1xf32, #tpu.memory_space<vmem>>, %arg29: memref<1x16x16xf32, #tpu.memory_space<vmem>>, %arg30: memref<1x2x128xf32, #tpu.memory_space<vmem>>, %arg31: memref<1x14x128xf32, #tpu.memory_space<vmem>>) attributes {dimension_semantics = [#tpu.dimension_semantics<parallel>], iteration_bounds = array<i64: 2>, scalar_prefetch = 0 : i64, scratch_operands = 0 : i64, tpu.core_type = #tpu.core_type<tc>, window_params = [{pipeline_mode = #tpu.pipeline_mode<synchronous>, transform_indices = @transform_0, window_bounds = array<i64: 2, 20>}, {pipeline_mode = #tpu.pipeline_mode<synchronous>, transform_indices = @transform_1, window_bounds = array<i64: 14, 24>}, {pipeline_mode = #tpu.pipeline_mode<synchronous>, transform_indices = @transform_2, window_bounds = array<i64: 2, 5>}, {pipeline_mode = #tpu.pipeline_mode<synchronous>, transform_indices = @transform_3, window_bounds = array<i64: 14, 3>}, {transform_indices = @transform_4, window_bounds = array<i64: 1, 20, 16>}, {transform_indices = @transform_5, window_bounds = array<i64: 1, 1, 16>}, {transform_indices = @transform_6, window_bounds = array<i64: 1, 24, 16>}, {transform_indices = @transform_7, window_bounds = array<i64: 1, 1, 16>}, {transform_indices = @transform_8, window_bounds = array<i64: 1, 1, 1, 16>}, {transform_indices = @transform_9, window_bounds = array<i64: 1, 1, 1, 16>}, {transform_indices = @transform_10, window_bounds = array<i64: 1, 1, 16, 48>}, {transform_indices = @transform_11, window_bounds = array<i64: 1, 1, 1, 48>}, {transform_indices = @transform_12, window_bounds = array<i64: 1, 1, 16, 16>}, {transform_indices = @transform_13, window_bounds = array<i64: 1, 1, 1, 16>}, {transform_indices = @transform_14, window_bounds = array<i64: 1, 1, 1, 16>}, {transform_indices = @transform_15, window_bounds = array<i64: 1, 1, 1, 16>}, {transform_indices = @transform_16, window_bounds = array<i64: 1, 1, 16, 64>}, {transform_indices = @transform_17, window_bounds = array<i64: 1, 1, 1, 64>}, {transform_indices = @transform_18, window_bounds = array<i64: 1, 1, 64, 16>}, {transform_indices = @transform_19, window_bounds = array<i64: 1, 1, 1, 16>}, {transform_indices = @transform_20, window_bounds = array<i64: 1, 1, 16>}, {transform_indices = @transform_21, window_bounds = array<i64: 1, 1, 16>}, {pipeline_mode = #tpu.pipeline_mode<synchronous>, transform_indices = @transform_22, window_bounds = array<i64: 16, 5>}, {pipeline_mode = #tpu.pipeline_mode<synchronous>, transform_indices = @transform_23, window_bounds = array<i64: 1, 5>}, {pipeline_mode = #tpu.pipeline_mode<synchronous>, transform_indices = @transform_24, window_bounds = array<i64: 16, 4>}, {pipeline_mode = #tpu.pipeline_mode<synchronous>, transform_indices = @transform_25, window_bounds = array<i64: 1, 4>}, {pipeline_mode = #tpu.pipeline_mode<synchronous>, transform_indices = @transform_26, window_bounds = array<i64: 16, 1>}, {pipeline_mode = #tpu.pipeline_mode<synchronous>, transform_indices = @transform_27, window_bounds = array<i64: 1, 1>}, {transform_indices = @transform_28, window_bounds = array<i64: 1, 16, 16>}, {transform_indices = @transform_29, window_bounds = array<i64: 1, 2, 128>}, {transform_indices = @transform_30, window_bounds = array<i64: 1, 14, 128>}]} {
    %c0 = arith.constant 0 : index
    %c0_0 = arith.constant 0 : index
    %0 = vector.load %arg1[%c0, %c0_0] : memref<2x20xf32, #tpu.memory_space<vmem>>, vector<2x20xf32>
    %c0_1 = arith.constant 0 : index
    %c0_2 = arith.constant 0 : index
    %c0_3 = arith.constant 0 : index
    %1 = vector.load %arg5[%c0_1, %c0_2, %c0_3] : memref<1x20x16xf32, #tpu.memory_space<vmem>>, vector<1x20x16xf32>
    %2 = vector.shape_cast %1 : vector<1x20x16xf32> to vector<20x16xf32>
    %cst = arith.constant dense<0.000000e+00> : vector<2x16xf32>
    %3 = tpu.matmul %0, %2, %cst {dimension_numbers = #tpu.dot_dimension_numbers<[1], [0], [0], [1], [0, 0, 1, 1], [], []>} : vector<2x20xf32>, vector<20x16xf32>, vector<2x16xf32> -> vector<2x16xf32>
    %c0_4 = arith.constant 0 : index
    %c0_5 = arith.constant 0 : index
    %c0_6 = arith.constant 0 : index
    %4 = vector.load %arg6[%c0_4, %c0_5, %c0_6] : memref<1x1x16xf32, #tpu.memory_space<vmem>>, vector<1x1x16xf32>
    %5 = vector.shape_cast %4 : vector<1x1x16xf32> to vector<1x16xf32>
    %6 = vector.broadcast %5 : vector<1x16xf32> to vector<2x16xf32>
    %7 = arith.addf %3, %6 : vector<2x16xf32>
    %c0_7 = arith.constant 0 : index
    %c0_8 = arith.constant 0 : index
    %8 = vector.load %arg2[%c0_7, %c0_8] : memref<14x24xf32, #tpu.memory_space<vmem>>, vector<14x24xf32>
    %c0_9 = arith.constant 0 : index
    %c0_10 = arith.constant 0 : index
    %c0_11 = arith.constant 0 : index
    %9 = vector.load %arg7[%c0_9, %c0_10, %c0_11] : memref<1x24x16xf32, #tpu.memory_space<vmem>>, vector<1x24x16xf32>
    %10 = vector.shape_cast %9 : vector<1x24x16xf32> to vector<24x16xf32>
    %cst_12 = arith.constant dense<0.000000e+00> : vector<14x16xf32>
    %11 = tpu.matmul %8, %10, %cst_12 {dimension_numbers = #tpu.dot_dimension_numbers<[1], [0], [0], [1], [0, 0, 1, 1], [], []>} : vector<14x24xf32>, vector<24x16xf32>, vector<14x16xf32> -> vector<14x16xf32>
    %c0_13 = arith.constant 0 : index
    %c0_14 = arith.constant 0 : index
    %c0_15 = arith.constant 0 : index
    %12 = vector.load %arg8[%c0_13, %c0_14, %c0_15] : memref<1x1x16xf32, #tpu.memory_space<vmem>>, vector<1x1x16xf32>
    %13 = vector.shape_cast %12 : vector<1x1x16xf32> to vector<1x16xf32>
    %14 = vector.broadcast %13 : vector<1x16xf32> to vector<14x16xf32>
    %15 = arith.addf %11, %14 : vector<14x16xf32>
    %16 = vector.extract_strided_slice %7 {offsets = [0, 0], sizes = [1, 16], strides = [1, 1]} : vector<2x16xf32> to vector<1x16xf32>
    %17 = vector.extract_strided_slice %15 {offsets = [0, 0], sizes = [7, 16], strides = [1, 1]} : vector<14x16xf32> to vector<7x16xf32>
    %18 = vector.extract_strided_slice %7 {offsets = [1, 0], sizes = [1, 16], strides = [1, 1]} : vector<2x16xf32> to vector<1x16xf32>
    %19 = vector.extract_strided_slice %15 {offsets = [7, 0], sizes = [7, 16], strides = [1, 1]} : vector<14x16xf32> to vector<7x16xf32>
    %20 = tpu.concatenate %16, %17, %18, %19 in 0 : vector<1x16xf32>, vector<7x16xf32>, vector<1x16xf32>, vector<7x16xf32> -> vector<16x16xf32>
    %c0_16 = arith.constant 0 : index
    %c0_17 = arith.constant 0 : index
    %c0_18 = arith.constant 0 : index
    %c0_19 = arith.constant 0 : index
    %21 = vector.load %arg9[%c0_16, %c0_17, %c0_18, %c0_19] : memref<1x1x1x16xf32, #tpu.memory_space<vmem>>, vector<1x1x1x16xf32>
    %22 = vector.shape_cast %21 : vector<1x1x1x16xf32> to vector<1x16xf32>
    %c0_20 = arith.constant 0 : index
    %c0_21 = arith.constant 0 : index
    %c0_22 = arith.constant 0 : index
    %c0_23 = arith.constant 0 : index
    %23 = vector.load %arg10[%c0_20, %c0_21, %c0_22, %c0_23] : memref<1x1x1x16xf32, #tpu.memory_space<vmem>>, vector<1x1x1x16xf32>
    %24 = vector.shape_cast %23 : vector<1x1x1x16xf32> to vector<1x16xf32>
    %cst_24 = arith.constant dense<0.000000e+00> : vector<16xf32>
    %25 = vector.multi_reduction <add>, %20, %cst_24 [1] : vector<16x16xf32> to vector<16xf32>
    %26 = vector.shape_cast %25 : vector<16xf32> to vector<16x1xf32>
    %cst_25 = arith.constant 1.600000e+01 : f32
    %27 = vector.broadcast %cst_25 : f32 to vector<16x1xf32>
    %28 = arith.divf %26, %27 : vector<16x1xf32>
    %29 = vector.broadcast %28 : vector<16x1xf32> to vector<16x16xf32>
    %30 = arith.subf %20, %29 : vector<16x16xf32>
    %31 = arith.mulf %30, %30 : vector<16x16xf32>
    %cst_26 = arith.constant dense<0.000000e+00> : vector<16xf32>
    %32 = vector.multi_reduction <add>, %31, %cst_26 [1] : vector<16x16xf32> to vector<16xf32>
    %33 = vector.shape_cast %32 : vector<16xf32> to vector<16x1xf32>
    %cst_27 = arith.constant 1.600000e+01 : f32
    %34 = vector.broadcast %cst_27 : f32 to vector<16x1xf32>
    %35 = arith.divf %33, %34 : vector<16x1xf32>
    %cst_28 = arith.constant 9.99999974E-6 : f32
    %36 = vector.broadcast %cst_28 : f32 to vector<16x1xf32>
    %37 = arith.addf %35, %36 : vector<16x1xf32>
    %38 = math.rsqrt %37 : vector<16x1xf32>
    %39 = vector.broadcast %38 : vector<16x1xf32> to vector<16x16xf32>
    %40 = arith.mulf %30, %39 : vector<16x16xf32>
    %41 = vector.broadcast %22 : vector<1x16xf32> to vector<16x16xf32>
    %42 = arith.mulf %40, %41 : vector<16x16xf32>
    %43 = vector.broadcast %24 : vector<1x16xf32> to vector<16x16xf32>
    %44 = arith.addf %42, %43 : vector<16x16xf32>
    %c0_29 = arith.constant 0 : index
    %c0_30 = arith.constant 0 : index
    %c0_31 = arith.constant 0 : index
    %c0_32 = arith.constant 0 : index
    %45 = vector.load %arg11[%c0_29, %c0_30, %c0_31, %c0_32] : memref<1x1x16x48xf32, #tpu.memory_space<vmem>>, vector<1x1x16x48xf32>
    %46 = vector.shape_cast %45 : vector<1x1x16x48xf32> to vector<16x48xf32>
    %cst_33 = arith.constant dense<0.000000e+00> : vector<16x48xf32>
    %47 = tpu.matmul %44, %46, %cst_33 {dimension_numbers = #tpu.dot_dimension_numbers<[1], [0], [0], [1], [0, 0, 1, 1], [], []>} : vector<16x16xf32>, vector<16x48xf32>, vector<16x48xf32> -> vector<16x48xf32>
    %c0_34 = arith.constant 0 : index
    %c0_35 = arith.constant 0 : index
    %c0_36 = arith.constant 0 : index
    %c0_37 = arith.constant 0 : index
    %48 = vector.load %arg12[%c0_34, %c0_35, %c0_36, %c0_37] : memref<1x1x1x48xf32, #tpu.memory_space<vmem>>, vector<1x1x1x48xf32>
    %49 = vector.shape_cast %48 : vector<1x1x1x48xf32> to vector<1x48xf32>
    %50 = vector.broadcast %49 : vector<1x48xf32> to vector<16x48xf32>
    %51 = arith.addf %47, %50 : vector<16x48xf32>
    %52 = vector.extract_strided_slice %51 {offsets = [0, 0], sizes = [16, 16], strides = [1, 1]} : vector<16x48xf32> to vector<16x16xf32>
    %53 = vector.extract_strided_slice %51 {offsets = [0, 16], sizes = [16, 16], strides = [1, 1]} : vector<16x48xf32> to vector<16x16xf32>
    %54 = vector.extract_strided_slice %51 {offsets = [0, 32], sizes = [16, 16], strides = [1, 1]} : vector<16x48xf32> to vector<16x16xf32>
    %55 = vector.extract_strided_slice %52 {offsets = [0, 0], sizes = [8, 16], strides = [1, 1]} : vector<16x16xf32> to vector<8x16xf32>
    %56 = vector.extract_strided_slice %53 {offsets = [0, 0], sizes = [8, 16], strides = [1, 1]} : vector<16x16xf32> to vector<8x16xf32>
    %57 = vector.extract_strided_slice %54 {offsets = [0, 0], sizes = [8, 16], strides = [1, 1]} : vector<16x16xf32> to vector<8x16xf32>
    %58 = vector.extract_strided_slice %55 {offsets = [0, 0], sizes = [8, 4], strides = [1, 1]} : vector<8x16xf32> to vector<8x4xf32>
    %59 = vector.extract_strided_slice %56 {offsets = [0, 0], sizes = [8, 4], strides = [1, 1]} : vector<8x16xf32> to vector<8x4xf32>
    %cst_38 = arith.constant dense<0.000000e+00> : vector<8x8xf32>
    %60 = tpu.matmul %58, %59, %cst_38 {dimension_numbers = #tpu.dot_dimension_numbers<[1], [1], [0], [0], [0, 0, 1, 0], [], []>} : vector<8x4xf32>, vector<8x4xf32>, vector<8x8xf32> -> vector<8x8xf32>
    %cst_39 = arith.constant 5.000000e-01 : f32
    %61 = vector.broadcast %cst_39 : f32 to vector<8x8xf32>
    %62 = arith.mulf %60, %61 : vector<8x8xf32>
    %cst_40 = arith.constant dense<0xFF800000> : vector<8xf32>
    %63 = vector.multi_reduction <maximumf>, %62, %cst_40 [1] : vector<8x8xf32> to vector<8xf32>
    %64 = vector.shape_cast %63 : vector<8xf32> to vector<8x1xf32>
    %65 = vector.broadcast %64 : vector<8x1xf32> to vector<8x8xf32>
    %66 = arith.subf %62, %65 : vector<8x8xf32>
    %67 = math.exp %66 : vector<8x8xf32>
    %cst_41 = arith.constant dense<0.000000e+00> : vector<8xf32>
    %68 = vector.multi_reduction <add>, %67, %cst_41 [1] : vector<8x8xf32> to vector<8xf32>
    %69 = vector.shape_cast %68 : vector<8xf32> to vector<8x1xf32>
    %70 = tpu.reciprocal %69 {approx = true} : vector<8x1xf32> -> vector<8x1xf32>
    %71 = vector.broadcast %70 : vector<8x1xf32> to vector<8x8xf32>
    %72 = arith.mulf %67, %71 : vector<8x8xf32>
    %73 = vector.extract_strided_slice %57 {offsets = [0, 0], sizes = [8, 4], strides = [1, 1]} : vector<8x16xf32> to vector<8x4xf32>
    %cst_42 = arith.constant dense<0.000000e+00> : vector<8x4xf32>
    %74 = tpu.matmul %72, %73, %cst_42 {dimension_numbers = #tpu.dot_dimension_numbers<[1], [0], [0], [1], [0, 0, 1, 1], [], []>} : vector<8x8xf32>, vector<8x4xf32>, vector<8x4xf32> -> vector<8x4xf32>
    %75 = vector.extract_strided_slice %55 {offsets = [0, 4], sizes = [8, 4], strides = [1, 1]} : vector<8x16xf32> to vector<8x4xf32>
    %76 = vector.extract_strided_slice %56 {offsets = [0, 4], sizes = [8, 4], strides = [1, 1]} : vector<8x16xf32> to vector<8x4xf32>
    %cst_43 = arith.constant dense<0.000000e+00> : vector<8x8xf32>
    %77 = tpu.matmul %75, %76, %cst_43 {dimension_numbers = #tpu.dot_dimension_numbers<[1], [1], [0], [0], [0, 0, 1, 0], [], []>} : vector<8x4xf32>, vector<8x4xf32>, vector<8x8xf32> -> vector<8x8xf32>
    %cst_44 = arith.constant 5.000000e-01 : f32
    %78 = vector.broadcast %cst_44 : f32 to vector<8x8xf32>
    %79 = arith.mulf %77, %78 : vector<8x8xf32>
    %cst_45 = arith.constant dense<0xFF800000> : vector<8xf32>
    %80 = vector.multi_reduction <maximumf>, %79, %cst_45 [1] : vector<8x8xf32> to vector<8xf32>
    %81 = vector.shape_cast %80 : vector<8xf32> to vector<8x1xf32>
    %82 = vector.broadcast %81 : vector<8x1xf32> to vector<8x8xf32>
    %83 = arith.subf %79, %82 : vector<8x8xf32>
    %84 = math.exp %83 : vector<8x8xf32>
    %cst_46 = arith.constant dense<0.000000e+00> : vector<8xf32>
    %85 = vector.multi_reduction <add>, %84, %cst_46 [1] : vector<8x8xf32> to vector<8xf32>
    %86 = vector.shape_cast %85 : vector<8xf32> to vector<8x1xf32>
    %87 = tpu.reciprocal %86 {approx = true} : vector<8x1xf32> -> vector<8x1xf32>
    %88 = vector.broadcast %87 : vector<8x1xf32> to vector<8x8xf32>
    %89 = arith.mulf %84, %88 : vector<8x8xf32>
    %90 = vector.extract_strided_slice %57 {offsets = [0, 4], sizes = [8, 4], strides = [1, 1]} : vector<8x16xf32> to vector<8x4xf32>
    %cst_47 = arith.constant dense<0.000000e+00> : vector<8x4xf32>
    %91 = tpu.matmul %89, %90, %cst_47 {dimension_numbers = #tpu.dot_dimension_numbers<[1], [0], [0], [1], [0, 0, 1, 1], [], []>} : vector<8x8xf32>, vector<8x4xf32>, vector<8x4xf32> -> vector<8x4xf32>
    %92 = vector.extract_strided_slice %55 {offsets = [0, 8], sizes = [8, 4], strides = [1, 1]} : vector<8x16xf32> to vector<8x4xf32>
    %93 = vector.extract_strided_slice %56 {offsets = [0, 8], sizes = [8, 4], strides = [1, 1]} : vector<8x16xf32> to vector<8x4xf32>
    %cst_48 = arith.constant dense<0.000000e+00> : vector<8x8xf32>
    %94 = tpu.matmul %92, %93, %cst_48 {dimension_numbers = #tpu.dot_dimension_numbers<[1], [1], [0], [0], [0, 0, 1, 0], [], []>} : vector<8x4xf32>, vector<8x4xf32>, vector<8x8xf32> -> vector<8x8xf32>
    %cst_49 = arith.constant 5.000000e-01 : f32
    %95 = vector.broadcast %cst_49 : f32 to vector<8x8xf32>
    %96 = arith.mulf %94, %95 : vector<8x8xf32>
    %cst_50 = arith.constant dense<0xFF800000> : vector<8xf32>
    %97 = vector.multi_reduction <maximumf>, %96, %cst_50 [1] : vector<8x8xf32> to vector<8xf32>
    %98 = vector.shape_cast %97 : vector<8xf32> to vector<8x1xf32>
    %99 = vector.broadcast %98 : vector<8x1xf32> to vector<8x8xf32>
    %100 = arith.subf %96, %99 : vector<8x8xf32>
    %101 = math.exp %100 : vector<8x8xf32>
    %cst_51 = arith.constant dense<0.000000e+00> : vector<8xf32>
    %102 = vector.multi_reduction <add>, %101, %cst_51 [1] : vector<8x8xf32> to vector<8xf32>
    %103 = vector.shape_cast %102 : vector<8xf32> to vector<8x1xf32>
    %104 = tpu.reciprocal %103 {approx = true} : vector<8x1xf32> -> vector<8x1xf32>
    %105 = vector.broadcast %104 : vector<8x1xf32> to vector<8x8xf32>
    %106 = arith.mulf %101, %105 : vector<8x8xf32>
    %107 = vector.extract_strided_slice %57 {offsets = [0, 8], sizes = [8, 4], strides = [1, 1]} : vector<8x16xf32> to vector<8x4xf32>
    %cst_52 = arith.constant dense<0.000000e+00> : vector<8x4xf32>
    %108 = tpu.matmul %106, %107, %cst_52 {dimension_numbers = #tpu.dot_dimension_numbers<[1], [0], [0], [1], [0, 0, 1, 1], [], []>} : vector<8x8xf32>, vector<8x4xf32>, vector<8x4xf32> -> vector<8x4xf32>
    %109 = vector.extract_strided_slice %55 {offsets = [0, 12], sizes = [8, 4], strides = [1, 1]} : vector<8x16xf32> to vector<8x4xf32>
    %110 = vector.extract_strided_slice %56 {offsets = [0, 12], sizes = [8, 4], strides = [1, 1]} : vector<8x16xf32> to vector<8x4xf32>
    %cst_53 = arith.constant dense<0.000000e+00> : vector<8x8xf32>
    %111 = tpu.matmul %109, %110, %cst_53 {dimension_numbers = #tpu.dot_dimension_numbers<[1], [1], [0], [0], [0, 0, 1, 0], [], []>} : vector<8x4xf32>, vector<8x4xf32>, vector<8x8xf32> -> vector<8x8xf32>
    %cst_54 = arith.constant 5.000000e-01 : f32
    %112 = vector.broadcast %cst_54 : f32 to vector<8x8xf32>
    %113 = arith.mulf %111, %112 : vector<8x8xf32>
    %cst_55 = arith.constant dense<0xFF800000> : vector<8xf32>
    %114 = vector.multi_reduction <maximumf>, %113, %cst_55 [1] : vector<8x8xf32> to vector<8xf32>
    %115 = vector.shape_cast %114 : vector<8xf32> to vector<8x1xf32>
    %116 = vector.broadcast %115 : vector<8x1xf32> to vector<8x8xf32>
    %117 = arith.subf %113, %116 : vector<8x8xf32>
    %118 = math.exp %117 : vector<8x8xf32>
    %cst_56 = arith.constant dense<0.000000e+00> : vector<8xf32>
    %119 = vector.multi_reduction <add>, %118, %cst_56 [1] : vector<8x8xf32> to vector<8xf32>
    %120 = vector.shape_cast %119 : vector<8xf32> to vector<8x1xf32>
    %121 = tpu.reciprocal %120 {approx = true} : vector<8x1xf32> -> vector<8x1xf32>
    %122 = vector.broadcast %121 : vector<8x1xf32> to vector<8x8xf32>
    %123 = arith.mulf %118, %122 : vector<8x8xf32>
    %124 = vector.extract_strided_slice %57 {offsets = [0, 12], sizes = [8, 4], strides = [1, 1]} : vector<8x16xf32> to vector<8x4xf32>
    %cst_57 = arith.constant dense<0.000000e+00> : vector<8x4xf32>
    %125 = tpu.matmul %123, %124, %cst_57 {dimension_numbers = #tpu.dot_dimension_numbers<[1], [0], [0], [1], [0, 0, 1, 1], [], []>} : vector<8x8xf32>, vector<8x4xf32>, vector<8x4xf32> -> vector<8x4xf32>
    %126 = tpu.concatenate %74, %91, %108, %125 in 1 : vector<8x4xf32>, vector<8x4xf32>, vector<8x4xf32>, vector<8x4xf32> -> vector<8x16xf32>
    %127 = vector.extract_strided_slice %52 {offsets = [8, 0], sizes = [8, 16], strides = [1, 1]} : vector<16x16xf32> to vector<8x16xf32>
    %128 = vector.extract_strided_slice %53 {offsets = [8, 0], sizes = [8, 16], strides = [1, 1]} : vector<16x16xf32> to vector<8x16xf32>
    %129 = vector.extract_strided_slice %54 {offsets = [8, 0], sizes = [8, 16], strides = [1, 1]} : vector<16x16xf32> to vector<8x16xf32>
    %130 = vector.extract_strided_slice %127 {offsets = [0, 0], sizes = [8, 4], strides = [1, 1]} : vector<8x16xf32> to vector<8x4xf32>
    %131 = vector.extract_strided_slice %128 {offsets = [0, 0], sizes = [8, 4], strides = [1, 1]} : vector<8x16xf32> to vector<8x4xf32>
    %cst_58 = arith.constant dense<0.000000e+00> : vector<8x8xf32>
    %132 = tpu.matmul %130, %131, %cst_58 {dimension_numbers = #tpu.dot_dimension_numbers<[1], [1], [0], [0], [0, 0, 1, 0], [], []>} : vector<8x4xf32>, vector<8x4xf32>, vector<8x8xf32> -> vector<8x8xf32>
    %cst_59 = arith.constant 5.000000e-01 : f32
    %133 = vector.broadcast %cst_59 : f32 to vector<8x8xf32>
    %134 = arith.mulf %132, %133 : vector<8x8xf32>
    %cst_60 = arith.constant dense<0xFF800000> : vector<8xf32>
    %135 = vector.multi_reduction <maximumf>, %134, %cst_60 [1] : vector<8x8xf32> to vector<8xf32>
    %136 = vector.shape_cast %135 : vector<8xf32> to vector<8x1xf32>
    %137 = vector.broadcast %136 : vector<8x1xf32> to vector<8x8xf32>
    %138 = arith.subf %134, %137 : vector<8x8xf32>
    %139 = math.exp %138 : vector<8x8xf32>
    %cst_61 = arith.constant dense<0.000000e+00> : vector<8xf32>
    %140 = vector.multi_reduction <add>, %139, %cst_61 [1] : vector<8x8xf32> to vector<8xf32>
    %141 = vector.shape_cast %140 : vector<8xf32> to vector<8x1xf32>
    %142 = tpu.reciprocal %141 {approx = true} : vector<8x1xf32> -> vector<8x1xf32>
    %143 = vector.broadcast %142 : vector<8x1xf32> to vector<8x8xf32>
    %144 = arith.mulf %139, %143 : vector<8x8xf32>
    %145 = vector.extract_strided_slice %129 {offsets = [0, 0], sizes = [8, 4], strides = [1, 1]} : vector<8x16xf32> to vector<8x4xf32>
    %cst_62 = arith.constant dense<0.000000e+00> : vector<8x4xf32>
    %146 = tpu.matmul %144, %145, %cst_62 {dimension_numbers = #tpu.dot_dimension_numbers<[1], [0], [0], [1], [0, 0, 1, 1], [], []>} : vector<8x8xf32>, vector<8x4xf32>, vector<8x4xf32> -> vector<8x4xf32>
    %147 = vector.extract_strided_slice %127 {offsets = [0, 4], sizes = [8, 4], strides = [1, 1]} : vector<8x16xf32> to vector<8x4xf32>
    %148 = vector.extract_strided_slice %128 {offsets = [0, 4], sizes = [8, 4], strides = [1, 1]} : vector<8x16xf32> to vector<8x4xf32>
    %cst_63 = arith.constant dense<0.000000e+00> : vector<8x8xf32>
    %149 = tpu.matmul %147, %148, %cst_63 {dimension_numbers = #tpu.dot_dimension_numbers<[1], [1], [0], [0], [0, 0, 1, 0], [], []>} : vector<8x4xf32>, vector<8x4xf32>, vector<8x8xf32> -> vector<8x8xf32>
    %cst_64 = arith.constant 5.000000e-01 : f32
    %150 = vector.broadcast %cst_64 : f32 to vector<8x8xf32>
    %151 = arith.mulf %149, %150 : vector<8x8xf32>
    %cst_65 = arith.constant dense<0xFF800000> : vector<8xf32>
    %152 = vector.multi_reduction <maximumf>, %151, %cst_65 [1] : vector<8x8xf32> to vector<8xf32>
    %153 = vector.shape_cast %152 : vector<8xf32> to vector<8x1xf32>
    %154 = vector.broadcast %153 : vector<8x1xf32> to vector<8x8xf32>
    %155 = arith.subf %151, %154 : vector<8x8xf32>
    %156 = math.exp %155 : vector<8x8xf32>
    %cst_66 = arith.constant dense<0.000000e+00> : vector<8xf32>
    %157 = vector.multi_reduction <add>, %156, %cst_66 [1] : vector<8x8xf32> to vector<8xf32>
    %158 = vector.shape_cast %157 : vector<8xf32> to vector<8x1xf32>
    %159 = tpu.reciprocal %158 {approx = true} : vector<8x1xf32> -> vector<8x1xf32>
    %160 = vector.broadcast %159 : vector<8x1xf32> to vector<8x8xf32>
    %161 = arith.mulf %156, %160 : vector<8x8xf32>
    %162 = vector.extract_strided_slice %129 {offsets = [0, 4], sizes = [8, 4], strides = [1, 1]} : vector<8x16xf32> to vector<8x4xf32>
    %cst_67 = arith.constant dense<0.000000e+00> : vector<8x4xf32>
    %163 = tpu.matmul %161, %162, %cst_67 {dimension_numbers = #tpu.dot_dimension_numbers<[1], [0], [0], [1], [0, 0, 1, 1], [], []>} : vector<8x8xf32>, vector<8x4xf32>, vector<8x4xf32> -> vector<8x4xf32>
    %164 = vector.extract_strided_slice %127 {offsets = [0, 8], sizes = [8, 4], strides = [1, 1]} : vector<8x16xf32> to vector<8x4xf32>
    %165 = vector.extract_strided_slice %128 {offsets = [0, 8], sizes = [8, 4], strides = [1, 1]} : vector<8x16xf32> to vector<8x4xf32>
    %cst_68 = arith.constant dense<0.000000e+00> : vector<8x8xf32>
    %166 = tpu.matmul %164, %165, %cst_68 {dimension_numbers = #tpu.dot_dimension_numbers<[1], [1], [0], [0], [0, 0, 1, 0], [], []>} : vector<8x4xf32>, vector<8x4xf32>, vector<8x8xf32> -> vector<8x8xf32>
    %cst_69 = arith.constant 5.000000e-01 : f32
    %167 = vector.broadcast %cst_69 : f32 to vector<8x8xf32>
    %168 = arith.mulf %166, %167 : vector<8x8xf32>
    %cst_70 = arith.constant dense<0xFF800000> : vector<8xf32>
    %169 = vector.multi_reduction <maximumf>, %168, %cst_70 [1] : vector<8x8xf32> to vector<8xf32>
    %170 = vector.shape_cast %169 : vector<8xf32> to vector<8x1xf32>
    %171 = vector.broadcast %170 : vector<8x1xf32> to vector<8x8xf32>
    %172 = arith.subf %168, %171 : vector<8x8xf32>
    %173 = math.exp %172 : vector<8x8xf32>
    %cst_71 = arith.constant dense<0.000000e+00> : vector<8xf32>
    %174 = vector.multi_reduction <add>, %173, %cst_71 [1] : vector<8x8xf32> to vector<8xf32>
    %175 = vector.shape_cast %174 : vector<8xf32> to vector<8x1xf32>
    %176 = tpu.reciprocal %175 {approx = true} : vector<8x1xf32> -> vector<8x1xf32>
    %177 = vector.broadcast %176 : vector<8x1xf32> to vector<8x8xf32>
    %178 = arith.mulf %173, %177 : vector<8x8xf32>
    %179 = vector.extract_strided_slice %129 {offsets = [0, 8], sizes = [8, 4], strides = [1, 1]} : vector<8x16xf32> to vector<8x4xf32>
    %cst_72 = arith.constant dense<0.000000e+00> : vector<8x4xf32>
    %180 = tpu.matmul %178, %179, %cst_72 {dimension_numbers = #tpu.dot_dimension_numbers<[1], [0], [0], [1], [0, 0, 1, 1], [], []>} : vector<8x8xf32>, vector<8x4xf32>, vector<8x4xf32> -> vector<8x4xf32>
    %181 = vector.extract_strided_slice %127 {offsets = [0, 12], sizes = [8, 4], strides = [1, 1]} : vector<8x16xf32> to vector<8x4xf32>
    %182 = vector.extract_strided_slice %128 {offsets = [0, 12], sizes = [8, 4], strides = [1, 1]} : vector<8x16xf32> to vector<8x4xf32>
    %cst_73 = arith.constant dense<0.000000e+00> : vector<8x8xf32>
    %183 = tpu.matmul %181, %182, %cst_73 {dimension_numbers = #tpu.dot_dimension_numbers<[1], [1], [0], [0], [0, 0, 1, 0], [], []>} : vector<8x4xf32>, vector<8x4xf32>, vector<8x8xf32> -> vector<8x8xf32>
    %cst_74 = arith.constant 5.000000e-01 : f32
    %184 = vector.broadcast %cst_74 : f32 to vector<8x8xf32>
    %185 = arith.mulf %183, %184 : vector<8x8xf32>
    %cst_75 = arith.constant dense<0xFF800000> : vector<8xf32>
    %186 = vector.multi_reduction <maximumf>, %185, %cst_75 [1] : vector<8x8xf32> to vector<8xf32>
    %187 = vector.shape_cast %186 : vector<8xf32> to vector<8x1xf32>
    %188 = vector.broadcast %187 : vector<8x1xf32> to vector<8x8xf32>
    %189 = arith.subf %185, %188 : vector<8x8xf32>
    %190 = math.exp %189 : vector<8x8xf32>
    %cst_76 = arith.constant dense<0.000000e+00> : vector<8xf32>
    %191 = vector.multi_reduction <add>, %190, %cst_76 [1] : vector<8x8xf32> to vector<8xf32>
    %192 = vector.shape_cast %191 : vector<8xf32> to vector<8x1xf32>
    %193 = tpu.reciprocal %192 {approx = true} : vector<8x1xf32> -> vector<8x1xf32>
    %194 = vector.broadcast %193 : vector<8x1xf32> to vector<8x8xf32>
    %195 = arith.mulf %190, %194 : vector<8x8xf32>
    %196 = vector.extract_strided_slice %129 {offsets = [0, 12], sizes = [8, 4], strides = [1, 1]} : vector<8x16xf32> to vector<8x4xf32>
    %cst_77 = arith.constant dense<0.000000e+00> : vector<8x4xf32>
    %197 = tpu.matmul %195, %196, %cst_77 {dimension_numbers = #tpu.dot_dimension_numbers<[1], [0], [0], [1], [0, 0, 1, 1], [], []>} : vector<8x8xf32>, vector<8x4xf32>, vector<8x4xf32> -> vector<8x4xf32>
    %198 = tpu.concatenate %146, %163, %180, %197 in 1 : vector<8x4xf32>, vector<8x4xf32>, vector<8x4xf32>, vector<8x4xf32> -> vector<8x16xf32>
    %199 = tpu.concatenate %126, %198 in 0 : vector<8x16xf32>, vector<8x16xf32> -> vector<16x16xf32>
    %c0_78 = arith.constant 0 : index
    %c0_79 = arith.constant 0 : index
    %c0_80 = arith.constant 0 : index
    %c0_81 = arith.constant 0 : index
    %200 = vector.load %arg13[%c0_78, %c0_79, %c0_80, %c0_81] : memref<1x1x16x16xf32, #tpu.memory_space<vmem>>, vector<1x1x16x16xf32>
    %201 = vector.shape_cast %200 : vector<1x1x16x16xf32> to vector<16x16xf32>
    %cst_82 = arith.constant dense<0.000000e+00> : vector<16x16xf32>
    %202 = tpu.matmul %199, %201, %cst_82 {dimension_numbers = #tpu.dot_dimension_numbers<[1], [0], [0], [1], [0, 0, 1, 1], [], []>} : vector<16x16xf32>, vector<16x16xf32>, vector<16x16xf32> -> vector<16x16xf32>
    %203 = arith.addf %20, %202 : vector<16x16xf32>
    %c0_83 = arith.constant 0 : index
    %c0_84 = arith.constant 0 : index
    %c0_85 = arith.constant 0 : index
    %c0_86 = arith.constant 0 : index
    %204 = vector.load %arg14[%c0_83, %c0_84, %c0_85, %c0_86] : memref<1x1x1x16xf32, #tpu.memory_space<vmem>>, vector<1x1x1x16xf32>
    %205 = vector.shape_cast %204 : vector<1x1x1x16xf32> to vector<1x16xf32>
    %206 = vector.broadcast %205 : vector<1x16xf32> to vector<16x16xf32>
    %207 = arith.addf %203, %206 : vector<16x16xf32>
    %c0_87 = arith.constant 0 : index
    %c0_88 = arith.constant 0 : index
    %c0_89 = arith.constant 0 : index
    %c0_90 = arith.constant 0 : index
    %208 = vector.load %arg15[%c0_87, %c0_88, %c0_89, %c0_90] : memref<1x1x1x16xf32, #tpu.memory_space<vmem>>, vector<1x1x1x16xf32>
    %209 = vector.shape_cast %208 : vector<1x1x1x16xf32> to vector<1x16xf32>
    %c0_91 = arith.constant 0 : index
    %c0_92 = arith.constant 0 : index
    %c0_93 = arith.constant 0 : index
    %c0_94 = arith.constant 0 : index
    %210 = vector.load %arg16[%c0_91, %c0_92, %c0_93, %c0_94] : memref<1x1x1x16xf32, #tpu.memory_space<vmem>>, vector<1x1x1x16xf32>
    %211 = vector.shape_cast %210 : vector<1x1x1x16xf32> to vector<1x16xf32>
    %cst_95 = arith.constant dense<0.000000e+00> : vector<16xf32>
    %212 = vector.multi_reduction <add>, %207, %cst_95 [1] : vector<16x16xf32> to vector<16xf32>
    %213 = vector.shape_cast %212 : vector<16xf32> to vector<16x1xf32>
    %cst_96 = arith.constant 1.600000e+01 : f32
    %214 = vector.broadcast %cst_96 : f32 to vector<16x1xf32>
    %215 = arith.divf %213, %214 : vector<16x1xf32>
    %216 = vector.broadcast %215 : vector<16x1xf32> to vector<16x16xf32>
    %217 = arith.subf %207, %216 : vector<16x16xf32>
    %218 = arith.mulf %217, %217 : vector<16x16xf32>
    %cst_97 = arith.constant dense<0.000000e+00> : vector<16xf32>
    %219 = vector.multi_reduction <add>, %218, %cst_97 [1] : vector<16x16xf32> to vector<16xf32>
    %220 = vector.shape_cast %219 : vector<16xf32> to vector<16x1xf32>
    %cst_98 = arith.constant 1.600000e+01 : f32
    %221 = vector.broadcast %cst_98 : f32 to vector<16x1xf32>
    %222 = arith.divf %220, %221 : vector<16x1xf32>
    %cst_99 = arith.constant 9.99999974E-6 : f32
    %223 = vector.broadcast %cst_99 : f32 to vector<16x1xf32>
    %224 = arith.addf %222, %223 : vector<16x1xf32>
    %225 = math.rsqrt %224 : vector<16x1xf32>
    %226 = vector.broadcast %225 : vector<16x1xf32> to vector<16x16xf32>
    %227 = arith.mulf %217, %226 : vector<16x16xf32>
    %228 = vector.broadcast %209 : vector<1x16xf32> to vector<16x16xf32>
    %229 = arith.mulf %227, %228 : vector<16x16xf32>
    %230 = vector.broadcast %211 : vector<1x16xf32> to vector<16x16xf32>
    %231 = arith.addf %229, %230 : vector<16x16xf32>
    %c0_100 = arith.constant 0 : index
    %c0_101 = arith.constant 0 : index
    %c0_102 = arith.constant 0 : index
    %c0_103 = arith.constant 0 : index
    %232 = vector.load %arg17[%c0_100, %c0_101, %c0_102, %c0_103] : memref<1x1x16x64xf32, #tpu.memory_space<vmem>>, vector<1x1x16x64xf32>
    %233 = vector.shape_cast %232 : vector<1x1x16x64xf32> to vector<16x64xf32>
    %cst_104 = arith.constant dense<0.000000e+00> : vector<16x64xf32>
    %234 = tpu.matmul %231, %233, %cst_104 {dimension_numbers = #tpu.dot_dimension_numbers<[1], [0], [0], [1], [0, 0, 1, 1], [], []>} : vector<16x16xf32>, vector<16x64xf32>, vector<16x64xf32> -> vector<16x64xf32>
    %c0_105 = arith.constant 0 : index
    %c0_106 = arith.constant 0 : index
    %c0_107 = arith.constant 0 : index
    %c0_108 = arith.constant 0 : index
    %235 = vector.load %arg18[%c0_105, %c0_106, %c0_107, %c0_108] : memref<1x1x1x64xf32, #tpu.memory_space<vmem>>, vector<1x1x1x64xf32>
    %236 = vector.shape_cast %235 : vector<1x1x1x64xf32> to vector<1x64xf32>
    %237 = vector.broadcast %236 : vector<1x64xf32> to vector<16x64xf32>
    %238 = arith.addf %234, %237 : vector<16x64xf32>
    %cst_109 = arith.constant 5.000000e-01 : f32
    %239 = vector.broadcast %cst_109 : f32 to vector<16x64xf32>
    %240 = arith.mulf %239, %238 : vector<16x64xf32>
    %cst_110 = arith.constant 0.707106769 : f32
    %241 = vector.broadcast %cst_110 : f32 to vector<16x64xf32>
    %242 = arith.mulf %238, %241 : vector<16x64xf32>
    %243 = math.absf %242 : vector<16x64xf32>
    %cst_111 = arith.constant 0.327591091 : f32
    %244 = vector.broadcast %cst_111 : f32 to vector<16x64xf32>
    %245 = arith.mulf %244, %243 : vector<16x64xf32>
    %cst_112 = arith.constant 1.000000e+00 : f32
    %246 = vector.broadcast %cst_112 : f32 to vector<16x64xf32>
    %247 = arith.addf %246, %245 : vector<16x64xf32>
    %cst_113 = arith.constant 1.000000e+00 : f32
    %248 = vector.broadcast %cst_113 : f32 to vector<16x64xf32>
    %249 = arith.divf %248, %247 : vector<16x64xf32>
    %cst_114 = arith.constant 1.06140542 : f32
    %250 = vector.broadcast %cst_114 : f32 to vector<16x64xf32>
    %251 = arith.mulf %250, %249 : vector<16x64xf32>
    %cst_115 = arith.constant -1.45315206 : f32
    %252 = vector.broadcast %cst_115 : f32 to vector<16x64xf32>
    %253 = arith.addf %251, %252 : vector<16x64xf32>
    %254 = arith.mulf %253, %249 : vector<16x64xf32>
    %cst_116 = arith.constant 1.42141378 : f32
    %255 = vector.broadcast %cst_116 : f32 to vector<16x64xf32>
    %256 = arith.addf %254, %255 : vector<16x64xf32>
    %257 = arith.mulf %256, %249 : vector<16x64xf32>
    %cst_117 = arith.constant -0.284496725 : f32
    %258 = vector.broadcast %cst_117 : f32 to vector<16x64xf32>
    %259 = arith.addf %257, %258 : vector<16x64xf32>
    %260 = arith.mulf %259, %249 : vector<16x64xf32>
    %cst_118 = arith.constant 0.254829586 : f32
    %261 = vector.broadcast %cst_118 : f32 to vector<16x64xf32>
    %262 = arith.addf %260, %261 : vector<16x64xf32>
    %263 = arith.mulf %262, %249 : vector<16x64xf32>
    %cst_119 = arith.constant 0.000000e+00 : f32
    %264 = vector.broadcast %cst_119 : f32 to vector<16x64xf32>
    %265 = arith.subf %264, %243 : vector<16x64xf32>
    %266 = arith.mulf %265, %243 : vector<16x64xf32>
    %267 = math.exp %266 : vector<16x64xf32>
    %268 = arith.mulf %263, %267 : vector<16x64xf32>
    %cst_120 = arith.constant 1.000000e+00 : f32
    %269 = vector.broadcast %cst_120 : f32 to vector<16x64xf32>
    %270 = arith.subf %269, %268 : vector<16x64xf32>
    %cst_121 = arith.constant 0.000000e+00 : f32
    %271 = vector.broadcast %cst_121 : f32 to vector<16x64xf32>
    %272 = arith.cmpf olt, %242, %271 : vector<16x64xf32>
    %cst_122 = arith.constant 0.000000e+00 : f32
    %273 = vector.broadcast %cst_122 : f32 to vector<16x64xf32>
    %274 = arith.subf %273, %270 : vector<16x64xf32>
    %275 = arith.select %272, %274, %270 : vector<16x64xi1>, vector<16x64xf32>
    %cst_123 = arith.constant 1.000000e+00 : f32
    %276 = vector.broadcast %cst_123 : f32 to vector<16x64xf32>
    %277 = arith.addf %276, %275 : vector<16x64xf32>
    %278 = arith.mulf %240, %277 : vector<16x64xf32>
    %c0_124 = arith.constant 0 : index
    %c0_125 = arith.constant 0 : index
    %c0_126 = arith.constant 0 : index
    %c0_127 = arith.constant 0 : index
    %279 = vector.load %arg19[%c0_124, %c0_125, %c0_126, %c0_127] : memref<1x1x64x16xf32, #tpu.memory_space<vmem>>, vector<1x1x64x16xf32>
    %280 = vector.shape_cast %279 : vector<1x1x64x16xf32> to vector<64x16xf32>
    %cst_128 = arith.constant dense<0.000000e+00> : vector<16x16xf32>
    %281 = tpu.matmul %278, %280, %cst_128 {dimension_numbers = #tpu.dot_dimension_numbers<[1], [0], [0], [1], [0, 0, 1, 1], [], []>} : vector<16x64xf32>, vector<64x16xf32>, vector<16x16xf32> -> vector<16x16xf32>
    %282 = arith.addf %207, %281 : vector<16x16xf32>
    %c0_129 = arith.constant 0 : index
    %c0_130 = arith.constant 0 : index
    %c0_131 = arith.constant 0 : index
    %c0_132 = arith.constant 0 : index
    %283 = vector.load %arg20[%c0_129, %c0_130, %c0_131, %c0_132] : memref<1x1x1x16xf32, #tpu.memory_space<vmem>>, vector<1x1x1x16xf32>
    %284 = vector.shape_cast %283 : vector<1x1x1x16xf32> to vector<1x16xf32>
    %285 = vector.broadcast %284 : vector<1x16xf32> to vector<16x16xf32>
    %286 = arith.addf %282, %285 : vector<16x16xf32>
    %c0_133 = arith.constant 0 : index
    %c0_134 = arith.constant 0 : index
    %c0_135 = arith.constant 0 : index
    %287 = vector.load %arg21[%c0_133, %c0_134, %c0_135] : memref<1x1x16xf32, #tpu.memory_space<vmem>>, vector<1x1x16xf32>
    %288 = vector.shape_cast %287 : vector<1x1x16xf32> to vector<1x16xf32>
    %c0_136 = arith.constant 0 : index
    %c0_137 = arith.constant 0 : index
    %c0_138 = arith.constant 0 : index
    %289 = vector.load %arg22[%c0_136, %c0_137, %c0_138] : memref<1x1x16xf32, #tpu.memory_space<vmem>>, vector<1x1x16xf32>
    %290 = vector.shape_cast %289 : vector<1x1x16xf32> to vector<1x16xf32>
    %cst_139 = arith.constant dense<0.000000e+00> : vector<16xf32>
    %291 = vector.multi_reduction <add>, %286, %cst_139 [1] : vector<16x16xf32> to vector<16xf32>
    %292 = vector.shape_cast %291 : vector<16xf32> to vector<16x1xf32>
    %cst_140 = arith.constant 1.600000e+01 : f32
    %293 = vector.broadcast %cst_140 : f32 to vector<16x1xf32>
    %294 = arith.divf %292, %293 : vector<16x1xf32>
    %295 = vector.broadcast %294 : vector<16x1xf32> to vector<16x16xf32>
    %296 = arith.subf %286, %295 : vector<16x16xf32>
    %297 = arith.mulf %296, %296 : vector<16x16xf32>
    %cst_141 = arith.constant dense<0.000000e+00> : vector<16xf32>
    %298 = vector.multi_reduction <add>, %297, %cst_141 [1] : vector<16x16xf32> to vector<16xf32>
    %299 = vector.shape_cast %298 : vector<16xf32> to vector<16x1xf32>
    %cst_142 = arith.constant 1.600000e+01 : f32
    %300 = vector.broadcast %cst_142 : f32 to vector<16x1xf32>
    %301 = arith.divf %299, %300 : vector<16x1xf32>
    %cst_143 = arith.constant 9.99999974E-6 : f32
    %302 = vector.broadcast %cst_143 : f32 to vector<16x1xf32>
    %303 = arith.addf %301, %302 : vector<16x1xf32>
    %304 = math.rsqrt %303 : vector<16x1xf32>
    %305 = vector.broadcast %304 : vector<16x1xf32> to vector<16x16xf32>
    %306 = arith.mulf %296, %305 : vector<16x16xf32>
    %307 = vector.broadcast %288 : vector<1x16xf32> to vector<16x16xf32>
    %308 = arith.mulf %306, %307 : vector<16x16xf32>
    %309 = vector.broadcast %290 : vector<1x16xf32> to vector<16x16xf32>
    %310 = arith.addf %308, %309 : vector<16x16xf32>
    %c0_144 = arith.constant 0 : index
    %c0_145 = arith.constant 0 : index
    %c0_146 = arith.constant 0 : index
    %311 = vector.load %arg29[%c0_144, %c0_145, %c0_146] : memref<1x16x16xf32, #tpu.memory_space<vmem>>, vector<1x16x16xf32>
    %312 = vector.shape_cast %311 : vector<1x16x16xf32> to vector<16x16xf32>
    %313 = vector.shape_cast %310 : vector<16x16xf32> to vector<1x16x16xf32>
    tpu.vector_store %arg29[%c0_144, %c0_145, %c0_146], %313 {strides = array<i32>} : memref<1x16x16xf32, #tpu.memory_space<vmem>>, vector<1x16x16xf32>,
    %314 = vector.extract_strided_slice %310 {offsets = [0, 0], sizes = [1, 16], strides = [1, 1]} : vector<16x16xf32> to vector<1x16xf32>
    %315 = vector.extract_strided_slice %310 {offsets = [8, 0], sizes = [1, 16], strides = [1, 1]} : vector<16x16xf32> to vector<1x16xf32>
    %316 = tpu.concatenate %314, %315 in 0 : vector<1x16xf32>, vector<1x16xf32> -> vector<2x16xf32>
    %317 = vector.extract_strided_slice %310 {offsets = [1, 0], sizes = [7, 16], strides = [1, 1]} : vector<16x16xf32> to vector<7x16xf32>
    %318 = vector.extract_strided_slice %310 {offsets = [9, 0], sizes = [7, 16], strides = [1, 1]} : vector<16x16xf32> to vector<7x16xf32>
    %319 = tpu.concatenate %317, %318 in 0 : vector<7x16xf32>, vector<7x16xf32> -> vector<14x16xf32>
    %c0_i32 = arith.constant 0 : i32
    %320 = arith.cmpi eq, %arg0, %c0_i32 : i32
    %321 = arith.extui %320 : i1 to i32
    %c0_i32_147 = arith.constant 0 : i32
    %322 = arith.cmpi ne, %321, %c0_i32_147 : i32
    scf.if %322 {
      %c0_149 = arith.constant 0 : index
      %c0_150 = arith.constant 0 : index
      %326 = vector.load %arg23[%c0_149, %c0_150] : memref<16x5xf32, #tpu.memory_space<vmem>>, vector<16x5xf32>
      %cst_151 = arith.constant dense<0.000000e+00> : vector<2x5xf32>
      %327 = tpu.matmul %316, %326, %cst_151 {dimension_numbers = #tpu.dot_dimension_numbers<[1], [0], [0], [1], [0, 0, 1, 1], [], []>} : vector<2x16xf32>, vector<16x5xf32>, vector<2x5xf32> -> vector<2x5xf32>
      %c0_152 = arith.constant 0 : index
      %c0_153 = arith.constant 0 : index
      %328 = vector.load %arg24[%c0_152, %c0_153] : memref<1x5xf32, #tpu.memory_space<vmem>>, vector<1x5xf32>
      %329 = vector.broadcast %328 : vector<1x5xf32> to vector<2x5xf32>
      %330 = arith.addf %327, %329 : vector<2x5xf32>
      %c0_154 = arith.constant 0 : index
      %c0_155 = arith.constant 0 : index
      %331 = vector.load %arg3[%c0_154, %c0_155] : memref<2x5xi32, #tpu.memory_space<vmem>>, vector<2x5xi32>
      %c0_i32_156 = arith.constant 0 : i32
      %332 = vector.broadcast %c0_i32_156 : i32 to vector<2x5xi32>
      %333 = arith.cmpi ne, %331, %332 : vector<2x5xi32>
      %cst_157 = arith.constant -1.000000e+30 : f32
      %334 = vector.broadcast %cst_157 : f32 to vector<2x5xf32>
      %335 = arith.select %333, %330, %334 : vector<2x5xi1>, vector<2x5xf32>
      %c0_158 = arith.constant 0 : index
      %c0_159 = arith.constant 0 : index
      %336 = vector.load %arg25[%c0_158, %c0_159] : memref<16x4xf32, #tpu.memory_space<vmem>>, vector<16x4xf32>
      %cst_160 = arith.constant dense<0.000000e+00> : vector<14x4xf32>
      %337 = tpu.matmul %319, %336, %cst_160 {dimension_numbers = #tpu.dot_dimension_numbers<[1], [0], [0], [1], [0, 0, 1, 1], [], []>} : vector<14x16xf32>, vector<16x4xf32>, vector<14x4xf32> -> vector<14x4xf32>
      %c0_161 = arith.constant 0 : index
      %c0_162 = arith.constant 0 : index
      %338 = vector.load %arg26[%c0_161, %c0_162] : memref<1x4xf32, #tpu.memory_space<vmem>>, vector<1x4xf32>
      %339 = vector.broadcast %338 : vector<1x4xf32> to vector<14x4xf32>
      %340 = arith.addf %337, %339 : vector<14x4xf32>
      %c0_163 = arith.constant 0 : index
      %c0_164 = arith.constant 0 : index
      %341 = vector.load %arg4[%c0_163, %c0_164] : memref<14x3xi32, #tpu.memory_space<vmem>>, vector<14x3xi32>
      %c0_i32_165 = arith.constant 0 : i32
      %342 = vector.broadcast %c0_i32_165 : i32 to vector<14x3xi32>
      %343 = arith.cmpi ne, %341, %342 : vector<14x3xi32>
      %344 = vector.extract_strided_slice %340 {offsets = [0, 0], sizes = [14, 3], strides = [1, 1]} : vector<14x4xf32> to vector<14x3xf32>
      %cst_166 = arith.constant -1.000000e+30 : f32
      %345 = vector.broadcast %cst_166 : f32 to vector<14x3xf32>
      %346 = arith.select %343, %344, %345 : vector<14x3xi1>, vector<14x3xf32>
      %347 = vector.extract_strided_slice %340 {offsets = [0, 3], sizes = [14, 1], strides = [1, 1]} : vector<14x4xf32> to vector<14x1xf32>
      %348 = vector.extract_strided_slice %335 {offsets = [0, 0], sizes = [1, 5], strides = [1, 1]} : vector<2x5xf32> to vector<1x5xf32>
      %349 = vector.extract_strided_slice %346 {offsets = [0, 0], sizes = [7, 3], strides = [1, 1]} : vector<14x3xf32> to vector<7x3xf32>
      %350 = vector.shape_cast %348 : vector<1x5xf32> to vector<1x1x5xf32>
      %cst_167 = arith.constant dense<0xFF800000> : vector<1xf32>
      %351 = vector.multi_reduction <maximumf>, %350, %cst_167 [1, 2] : vector<1x1x5xf32> to vector<1xf32>
      %352 = vector.shape_cast %351 : vector<1xf32> to vector<1x1x1xf32>
      %353 = vector.extract %352[0, 0, 0] : f32 from vector<1x1x1xf32>
      %354 = vector.shape_cast %349 : vector<7x3xf32> to vector<1x7x3xf32>
      %cst_168 = arith.constant dense<0xFF800000> : vector<1xf32>
      %355 = vector.multi_reduction <maximumf>, %354, %cst_168 [1, 2] : vector<1x7x3xf32> to vector<1xf32>
      %356 = vector.shape_cast %355 : vector<1xf32> to vector<1x1x1xf32>
      %357 = vector.extract %356[0, 0, 0] : f32 from vector<1x1x1xf32>
      %358 = arith.maximumf %353, %357 : f32
      %359 = vector.broadcast %358 : f32 to vector<1x5xf32>
      %360 = arith.subf %348, %359 : vector<1x5xf32>
      %361 = math.exp %360 : vector<1x5xf32>
      %362 = vector.shape_cast %361 : vector<1x5xf32> to vector<1x1x5xf32>
      %cst_169 = arith.constant dense<0.000000e+00> : vector<1xf32>
      %363 = vector.multi_reduction <add>, %362, %cst_169 [1, 2] : vector<1x1x5xf32> to vector<1xf32>
      %364 = vector.shape_cast %363 : vector<1xf32> to vector<1x1x1xf32>
      %365 = vector.extract %364[0, 0, 0] : f32 from vector<1x1x1xf32>
      %366 = vector.broadcast %358 : f32 to vector<7x3xf32>
      %367 = arith.subf %349, %366 : vector<7x3xf32>
      %368 = math.exp %367 : vector<7x3xf32>
      %369 = vector.shape_cast %368 : vector<7x3xf32> to vector<1x7x3xf32>
      %cst_170 = arith.constant dense<0.000000e+00> : vector<1xf32>
      %370 = vector.multi_reduction <add>, %369, %cst_170 [1, 2] : vector<1x7x3xf32> to vector<1xf32>
      %371 = vector.shape_cast %370 : vector<1xf32> to vector<1x1x1xf32>
      %372 = vector.extract %371[0, 0, 0] : f32 from vector<1x1x1xf32>
      %373 = arith.addf %365, %372 : f32
      %374 = math.log %373 : f32
      %375 = arith.addf %358, %374 : f32
      %376 = vector.broadcast %375 : f32 to vector<1x5xf32>
      %377 = arith.subf %348, %376 : vector<1x5xf32>
      %378 = vector.broadcast %375 : f32 to vector<7x3xf32>
      %379 = arith.subf %349, %378 : vector<7x3xf32>
      %380 = vector.extract_strided_slice %335 {offsets = [1, 0], sizes = [1, 5], strides = [1, 1]} : vector<2x5xf32> to vector<1x5xf32>
      %381 = vector.extract_strided_slice %346 {offsets = [7, 0], sizes = [7, 3], strides = [1, 1]} : vector<14x3xf32> to vector<7x3xf32>
      %382 = vector.shape_cast %380 : vector<1x5xf32> to vector<1x1x5xf32>
      %cst_171 = arith.constant dense<0xFF800000> : vector<1xf32>
      %383 = vector.multi_reduction <maximumf>, %382, %cst_171 [1, 2] : vector<1x1x5xf32> to vector<1xf32>
      %384 = vector.shape_cast %383 : vector<1xf32> to vector<1x1x1xf32>
      %385 = vector.extract %384[0, 0, 0] : f32 from vector<1x1x1xf32>
      %386 = vector.shape_cast %381 : vector<7x3xf32> to vector<1x7x3xf32>
      %cst_172 = arith.constant dense<0xFF800000> : vector<1xf32>
      %387 = vector.multi_reduction <maximumf>, %386, %cst_172 [1, 2] : vector<1x7x3xf32> to vector<1xf32>
      %388 = vector.shape_cast %387 : vector<1xf32> to vector<1x1x1xf32>
      %389 = vector.extract %388[0, 0, 0] : f32 from vector<1x1x1xf32>
      %390 = arith.maximumf %385, %389 : f32
      %391 = vector.broadcast %390 : f32 to vector<1x5xf32>
      %392 = arith.subf %380, %391 : vector<1x5xf32>
      %393 = math.exp %392 : vector<1x5xf32>
      %394 = vector.shape_cast %393 : vector<1x5xf32> to vector<1x1x5xf32>
      %cst_173 = arith.constant dense<0.000000e+00> : vector<1xf32>
      %395 = vector.multi_reduction <add>, %394, %cst_173 [1, 2] : vector<1x1x5xf32> to vector<1xf32>
      %396 = vector.shape_cast %395 : vector<1xf32> to vector<1x1x1xf32>
      %397 = vector.extract %396[0, 0, 0] : f32 from vector<1x1x1xf32>
      %398 = vector.broadcast %390 : f32 to vector<7x3xf32>
      %399 = arith.subf %381, %398 : vector<7x3xf32>
      %400 = math.exp %399 : vector<7x3xf32>
      %401 = vector.shape_cast %400 : vector<7x3xf32> to vector<1x7x3xf32>
      %cst_174 = arith.constant dense<0.000000e+00> : vector<1xf32>
      %402 = vector.multi_reduction <add>, %401, %cst_174 [1, 2] : vector<1x7x3xf32> to vector<1xf32>
      %403 = vector.shape_cast %402 : vector<1xf32> to vector<1x1x1xf32>
      %404 = vector.extract %403[0, 0, 0] : f32 from vector<1x1x1xf32>
      %405 = arith.addf %397, %404 : f32
      %406 = math.log %405 : f32
      %407 = arith.addf %390, %406 : f32
      %408 = vector.broadcast %407 : f32 to vector<1x5xf32>
      %409 = arith.subf %380, %408 : vector<1x5xf32>
      %410 = vector.broadcast %407 : f32 to vector<7x3xf32>
      %411 = arith.subf %381, %410 : vector<7x3xf32>
      %412 = tpu.concatenate %377, %409 in 0 : vector<1x5xf32>, vector<1x5xf32> -> vector<2x5xf32>
      %413 = tpu.concatenate %379, %411 in 0 : vector<7x3xf32>, vector<7x3xf32> -> vector<14x3xf32>
      %cst_175 = arith.constant 0.000000e+00 : f32
      %414 = vector.broadcast %cst_175 : f32 to vector<2x123xf32>
      %415 = tpu.concatenate %412, %414 in 1 : vector<2x5xf32>, vector<2x123xf32> -> vector<2x128xf32>
      %c0_176 = arith.constant 0 : index
      %c0_177 = arith.constant 0 : index
      %c0_178 = arith.constant 0 : index
      %416 = vector.load %arg30[%c0_176, %c0_177, %c0_178] : memref<1x2x128xf32, #tpu.memory_space<vmem>>, vector<1x2x128xf32>
      %417 = vector.shape_cast %416 : vector<1x2x128xf32> to vector<2x128xf32>
      %418 = vector.shape_cast %415 : vector<2x128xf32> to vector<1x2x128xf32>
      tpu.vector_store %arg30[%c0_176, %c0_177, %c0_178], %418 {strides = array<i32>} : memref<1x2x128xf32, #tpu.memory_space<vmem>>, vector<1x2x128xf32>,
      %cst_179 = arith.constant 0.000000e+00 : f32
      %419 = vector.broadcast %cst_179 : f32 to vector<14x124xf32>
      %420 = tpu.concatenate %413, %347, %419 in 1 : vector<14x3xf32>, vector<14x1xf32>, vector<14x124xf32> -> vector<14x128xf32>
      %c0_180 = arith.constant 0 : index
      %c0_181 = arith.constant 0 : index
      %c0_182 = arith.constant 0 : index
      %421 = vector.load %arg31[%c0_180, %c0_181, %c0_182] : memref<1x14x128xf32, #tpu.memory_space<vmem>>, vector<1x14x128xf32>
      %422 = vector.shape_cast %421 : vector<1x14x128xf32> to vector<14x128xf32>
      %423 = vector.shape_cast %420 : vector<14x128xf32> to vector<1x14x128xf32>
      tpu.vector_store %arg31[%c0_180, %c0_181, %c0_182], %423 {strides = array<i32>} : memref<1x14x128xf32, #tpu.memory_space<vmem>>, vector<1x14x128xf32>,
    } else {
    }
    %true = arith.constant true
    %323 = arith.xori %320, %true : i1
    %324 = arith.extui %323 : i1 to i32
    %c0_i32_148 = arith.constant 0 : i32
    %325 = arith.cmpi ne, %324, %c0_i32_148 : i32
    scf.if %325 {
      %c0_149 = arith.constant 0 : index
      %c0_150 = arith.constant 0 : index
      %326 = vector.load %arg27[%c0_149, %c0_150] : memref<16x1xf32, #tpu.memory_space<vmem>>, vector<16x1xf32>
      %cst_151 = arith.constant dense<0.000000e+00> : vector<2x1xf32>
      %327 = tpu.matmul %316, %326, %cst_151 {dimension_numbers = #tpu.dot_dimension_numbers<[1], [0], [0], [1], [0, 0, 1, 1], [], []>} : vector<2x16xf32>, vector<16x1xf32>, vector<2x1xf32> -> vector<2x1xf32>
      %c0_152 = arith.constant 0 : index
      %c0_153 = arith.constant 0 : index
      %328 = vector.load %arg28[%c0_152, %c0_153] : memref<1x1xf32, #tpu.memory_space<vmem>>, vector<1x1xf32>
      %329 = vector.broadcast %328 : vector<1x1xf32> to vector<2x1xf32>
      %330 = arith.addf %327, %329 : vector<2x1xf32>
      %cst_154 = arith.constant 0.000000e+00 : f32
      %331 = vector.broadcast %cst_154 : f32 to vector<2x127xf32>
      %332 = tpu.concatenate %330, %331 in 1 : vector<2x1xf32>, vector<2x127xf32> -> vector<2x128xf32>
      %c0_155 = arith.constant 0 : index
      %c0_156 = arith.constant 0 : index
      %c0_157 = arith.constant 0 : index
      %333 = vector.load %arg30[%c0_155, %c0_156, %c0_157] : memref<1x2x128xf32, #tpu.memory_space<vmem>>, vector<1x2x128xf32>
      %334 = vector.shape_cast %333 : vector<1x2x128xf32> to vector<2x128xf32>
      %335 = vector.shape_cast %332 : vector<2x128xf32> to vector<1x2x128xf32>
      tpu.vector_store %arg30[%c0_155, %c0_156, %c0_157], %335 {strides = array<i32>} : memref<1x2x128xf32, #tpu.memory_space<vmem>>, vector<1x2x128xf32>,
      %cst_158 = arith.constant 0.000000e+00 : f32
      %336 = vector.broadcast %cst_158 : f32 to vector<14x128xf32>
      %c0_159 = arith.constant 0 : index
      %c0_160 = arith.constant 0 : index
      %c0_161 = arith.constant 0 : index
      %337 = vector.load %arg31[%c0_159, %c0_160, %c0_161] : memref<1x14x128xf32, #tpu.memory_space<vmem>>, vector<1x14x128xf32>
      %338 = vector.shape_cast %337 : vector<1x14x128xf32> to vector<14x128xf32>
      %339 = vector.shape_cast %336 : vector<14x128xf32> to vector<1x14x128xf32>
      tpu.vector_store %arg31[%c0_159, %c0_160, %c0_161], %339 {strides = array<i32>} : memref<1x14x128xf32, #tpu.memory_space<vmem>>, vector<1x14x128xf32>,
    } else {
    }
    return
  }
  func.func @transform_0(%arg0: i32) -> (i32, i32) {
    %c0_i32 = arith.constant 0 : i32
    %c0_i32_0 = arith.constant 0 : i32
    %c0_i32_1 = arith.constant 0 : i32
    return %c0_i32, %c0_i32_0 : i32, i32
  }
  func.func @transform_1(%arg0: i32) -> (i32, i32) {
    %c0_i32 = arith.constant 0 : i32
    %c0_i32_0 = arith.constant 0 : i32
    %c0_i32_1 = arith.constant 0 : i32
    return %c0_i32, %c0_i32_0 : i32, i32
  }
  func.func @transform_2(%arg0: i32) -> (i32, i32) {
    %c0_i32 = arith.constant 0 : i32
    %c0_i32_0 = arith.constant 0 : i32
    %c0_i32_1 = arith.constant 0 : i32
    return %c0_i32, %c0_i32_0 : i32, i32
  }
  func.func @transform_3(%arg0: i32) -> (i32, i32) {
    %c0_i32 = arith.constant 0 : i32
    %c0_i32_0 = arith.constant 0 : i32
    %c0_i32_1 = arith.constant 0 : i32
    return %c0_i32, %c0_i32_0 : i32, i32
  }
  func.func @transform_4(%arg0: i32) -> (i32, i32, i32) {
    %c0_i32 = arith.constant 0 : i32
    %c0_i32_0 = arith.constant 0 : i32
    %c0_i32_1 = arith.constant 0 : i32
    return %arg0, %c0_i32, %c0_i32_0 : i32, i32, i32
  }
  func.func @transform_5(%arg0: i32) -> (i32, i32, i32) {
    %c0_i32 = arith.constant 0 : i32
    %c0_i32_0 = arith.constant 0 : i32
    %c0_i32_1 = arith.constant 0 : i32
    return %arg0, %c0_i32, %c0_i32_0 : i32, i32, i32
  }
  func.func @transform_6(%arg0: i32) -> (i32, i32, i32) {
    %c0_i32 = arith.constant 0 : i32
    %c0_i32_0 = arith.constant 0 : i32
    %c0_i32_1 = arith.constant 0 : i32
    return %arg0, %c0_i32, %c0_i32_0 : i32, i32, i32
  }
  func.func @transform_7(%arg0: i32) -> (i32, i32, i32) {
    %c0_i32 = arith.constant 0 : i32
    %c0_i32_0 = arith.constant 0 : i32
    %c0_i32_1 = arith.constant 0 : i32
    return %arg0, %c0_i32, %c0_i32_0 : i32, i32, i32
  }
  func.func @transform_8(%arg0: i32) -> (i32, i32, i32, i32) {
    %c0_i32 = arith.constant 0 : i32
    %c0_i32_0 = arith.constant 0 : i32
    %c0_i32_1 = arith.constant 0 : i32
    %c0_i32_2 = arith.constant 0 : i32
    return %arg0, %c0_i32, %c0_i32_0, %c0_i32_1 : i32, i32, i32, i32
  }
  func.func @transform_9(%arg0: i32) -> (i32, i32, i32, i32) {
    %c0_i32 = arith.constant 0 : i32
    %c0_i32_0 = arith.constant 0 : i32
    %c0_i32_1 = arith.constant 0 : i32
    %c0_i32_2 = arith.constant 0 : i32
    return %arg0, %c0_i32, %c0_i32_0, %c0_i32_1 : i32, i32, i32, i32
  }
  func.func @transform_10(%arg0: i32) -> (i32, i32, i32, i32) {
    %c0_i32 = arith.constant 0 : i32
    %c0_i32_0 = arith.constant 0 : i32
    %c0_i32_1 = arith.constant 0 : i32
    %c0_i32_2 = arith.constant 0 : i32
    return %arg0, %c0_i32, %c0_i32_0, %c0_i32_1 : i32, i32, i32, i32
  }
  func.func @transform_11(%arg0: i32) -> (i32, i32, i32, i32) {
    %c0_i32 = arith.constant 0 : i32
    %c0_i32_0 = arith.constant 0 : i32
    %c0_i32_1 = arith.constant 0 : i32
    %c0_i32_2 = arith.constant 0 : i32
    return %arg0, %c0_i32, %c0_i32_0, %c0_i32_1 : i32, i32, i32, i32
  }
  func.func @transform_12(%arg0: i32) -> (i32, i32, i32, i32) {
    %c0_i32 = arith.constant 0 : i32
    %c0_i32_0 = arith.constant 0 : i32
    %c0_i32_1 = arith.constant 0 : i32
    %c0_i32_2 = arith.constant 0 : i32
    return %arg0, %c0_i32, %c0_i32_0, %c0_i32_1 : i32, i32, i32, i32
  }
  func.func @transform_13(%arg0: i32) -> (i32, i32, i32, i32) {
    %c0_i32 = arith.constant 0 : i32
    %c0_i32_0 = arith.constant 0 : i32
    %c0_i32_1 = arith.constant 0 : i32
    %c0_i32_2 = arith.constant 0 : i32
    return %arg0, %c0_i32, %c0_i32_0, %c0_i32_1 : i32, i32, i32, i32
  }
  func.func @transform_14(%arg0: i32) -> (i32, i32, i32, i32) {
    %c0_i32 = arith.constant 0 : i32
    %c0_i32_0 = arith.constant 0 : i32
    %c0_i32_1 = arith.constant 0 : i32
    %c0_i32_2 = arith.constant 0 : i32
    return %arg0, %c0_i32, %c0_i32_0, %c0_i32_1 : i32, i32, i32, i32
  }
  func.func @transform_15(%arg0: i32) -> (i32, i32, i32, i32) {
    %c0_i32 = arith.constant 0 : i32
    %c0_i32_0 = arith.constant 0 : i32
    %c0_i32_1 = arith.constant 0 : i32
    %c0_i32_2 = arith.constant 0 : i32
    return %arg0, %c0_i32, %c0_i32_0, %c0_i32_1 : i32, i32, i32, i32
  }
  func.func @transform_16(%arg0: i32) -> (i32, i32, i32, i32) {
    %c0_i32 = arith.constant 0 : i32
    %c0_i32_0 = arith.constant 0 : i32
    %c0_i32_1 = arith.constant 0 : i32
    %c0_i32_2 = arith.constant 0 : i32
    return %arg0, %c0_i32, %c0_i32_0, %c0_i32_1 : i32, i32, i32, i32
  }
  func.func @transform_17(%arg0: i32) -> (i32, i32, i32, i32) {
    %c0_i32 = arith.constant 0 : i32
    %c0_i32_0 = arith.constant 0 : i32
    %c0_i32_1 = arith.constant 0 : i32
    %c0_i32_2 = arith.constant 0 : i32
    return %arg0, %c0_i32, %c0_i32_0, %c0_i32_1 : i32, i32, i32, i32
  }
  func.func @transform_18(%arg0: i32) -> (i32, i32, i32, i32) {
    %c0_i32 = arith.constant 0 : i32
    %c0_i32_0 = arith.constant 0 : i32
    %c0_i32_1 = arith.constant 0 : i32
    %c0_i32_2 = arith.constant 0 : i32
    return %arg0, %c0_i32, %c0_i32_0, %c0_i32_1 : i32, i32, i32, i32
  }
  func.func @transform_19(%arg0: i32) -> (i32, i32, i32, i32) {
    %c0_i32 = arith.constant 0 : i32
    %c0_i32_0 = arith.constant 0 : i32
    %c0_i32_1 = arith.constant 0 : i32
    %c0_i32_2 = arith.constant 0 : i32
    return %arg0, %c0_i32, %c0_i32_0, %c0_i32_1 : i32, i32, i32, i32
  }
  func.func @transform_20(%arg0: i32) -> (i32, i32, i32) {
    %c0_i32 = arith.constant 0 : i32
    %c0_i32_0 = arith.constant 0 : i32
    %c0_i32_1 = arith.constant 0 : i32
    return %arg0, %c0_i32, %c0_i32_0 : i32, i32, i32
  }
  func.func @transform_21(%arg0: i32) -> (i32, i32, i32) {
    %c0_i32 = arith.constant 0 : i32
    %c0_i32_0 = arith.constant 0 : i32
    %c0_i32_1 = arith.constant 0 : i32
    return %arg0, %c0_i32, %c0_i32_0 : i32, i32, i32
  }
  func.func @transform_22(%arg0: i32) -> (i32, i32) {
    %c0_i32 = arith.constant 0 : i32
    %c0_i32_0 = arith.constant 0 : i32
    %c0_i32_1 = arith.constant 0 : i32
    return %c0_i32, %c0_i32_0 : i32, i32
  }
  func.func @transform_23(%arg0: i32) -> (i32, i32) {
    %c0_i32 = arith.constant 0 : i32
    %c0_i32_0 = arith.constant 0 : i32
    %c0_i32_1 = arith.constant 0 : i32
    return %c0_i32, %c0_i32_0 : i32, i32
  }
  func.func @transform_24(%arg0: i32) -> (i32, i32) {
    %c0_i32 = arith.constant 0 : i32
    %c0_i32_0 = arith.constant 0 : i32
    %c0_i32_1 = arith.constant 0 : i32
    return %c0_i32, %c0_i32_0 : i32, i32
  }
  func.func @transform_25(%arg0: i32) -> (i32, i32) {
    %c0_i32 = arith.constant 0 : i32
    %c0_i32_0 = arith.constant 0 : i32
    %c0_i32_1 = arith.constant 0 : i32
    return %c0_i32, %c0_i32_0 : i32, i32
  }
  func.func @transform_26(%arg0: i32) -> (i32, i32) {
    %c0_i32 = arith.constant 0 : i32
    %c0_i32_0 = arith.constant 0 : i32
    %c0_i32_1 = arith.constant 0 : i32
    return %c0_i32, %c0_i32_0 : i32, i32
  }
  func.func @transform_27(%arg0: i32) -> (i32, i32) {
    %c0_i32 = arith.constant 0 : i32
    %c0_i32_0 = arith.constant 0 : i32
    %c0_i32_1 = arith.constant 0 : i32
    return %c0_i32, %c0_i32_0 : i32, i32
  }
  func.func @transform_28(%arg0: i32) -> (i32, i32, i32) {
    %c0_i32 = arith.constant 0 : i32
    %c0_i32_0 = arith.constant 0 : i32
    %c0_i32_1 = arith.constant 0 : i32
    return %arg0, %c0_i32, %c0_i32_0 : i32, i32, i32
  }
  func.func @transform_29(%arg0: i32) -> (i32, i32, i32) {
    %c0_i32 = arith.constant 0 : i32
    %c0_i32_0 = arith.constant 0 : i32
    %c0_i32_1 = arith.constant 0 : i32
    return %arg0, %c0_i32, %c0_i32_0 : i32, i32, i32
  }
  func.func @transform_30(%arg0: i32) -> (i32, i32, i32) {
    %c0_i32 = arith.constant 0 : i32
    %c0_i32_0 = arith.constant 0 : i32
    %c0_i32_1 = arith.constant 0 : i32
    return %arg0, %c0_i32, %c0_i32_0 : i32, i32, i32
  }
}

</mosaic_0001>

<bundles_post_ra>
// kernel: tpu_custom_call.1
= control target key start
LH: loop header
LB: loop body
LE: loop exit
PB: predicated region body
PF: predicated region fallthrough
CT: control target
= control target key end

     0   :  { %s4779_s6 = smov 1   ;;  %s4780_s10 = smov 2   ;;  %s5434_s0 = inlined_call_operand.smem [shape: u32[31], index: -1, kind: input, shape index: {}] }
   0x1   :  { %s4843_s5 = sld [smem:[%s5434_s0]]   ;;  %s4781_s14 = smov 3  }
   0x2   :  { %s4848_s9 = sld [smem:[%s5434_s0 + %s4779_s6]]   ;;  %s4782_s18 = smov 4  }
   0x3   :  { %s4853_s13 = sld [smem:[%s5434_s0 + %s4780_s10]]   ;;  %s4783_s22 = smov 5  }
   0x4   :  { %s4858_s17 = sld [smem:[%s5434_s0 + %s4781_s14]]   ;;  %s4784_s26 = smov 6  }
   0x5   :  { %s4863_s21 = sld [smem:[%s5434_s0 + %s4782_s18]]   ;;  %s4785_s30 = smov 7  }
   0x6   :  { %s4868_s25 = sld [smem:[%s5434_s0 + %s4783_s22]]   ;;  %s4786_s4 = smov 8  }
   0x7   :  { %5446 = sst [smem:[#allocation9_spill]] %s4843_s5  ;;  %s4787_s10 = smov 9  }
   0x8   :  { %5447 = sst [smem:[#allocation10_spill]] %s4848_s9  ;;  %s4788_s15 = smov 10  }
   0x9   :  { %5448 = sst [smem:[#allocation11_spill]] %s4853_s13  ;;  %s4789_s20 = smov 11  }
   0xa   :  { %5449 = sst [smem:[#allocation12_spill]] %s4858_s17  ;;  %s4791_s1 = smov 13  }
   0xb   :  { %s4873_s29 = sld [smem:[%s5434_s0 + %s4784_s26]]   ;;  %s4790_s26 = smov 12  }
   0xc   :  { %s4878_s3 = sld [smem:[%s5434_s0 + %s4785_s30]]   ;;  %s4792_s7 = smov 14  }
   0xd   :  { %s4883_s8 = sld [smem:[%s5434_s0 + %s4786_s4]]   ;;  %s4794_s22 = smov 16  }
   0xe   :  { %s4888_s14 = sld [smem:[%s5434_s0 + %s4787_s10]]   ;;  %s4795_s28 = smov 17  }
   0xf   :  { %s4893_s19 = sld [smem:[%s5434_s0 + %s4788_s15]]   ;;  %s4793_s15 = smov 15  }
  0x10   :  { %s4898_s24 = sld [smem:[%s5434_s0 + %s4789_s20]]   ;;  %s4806_s23 = smov 28  }
  0x11   :  { %s4903_s30 = sld [smem:[%s5434_s0 + %s4790_s26]]   ;;  %s4808_s10 = smov 30  }
  0x12   :  { %5450 = sst [smem:[#allocation13_spill]] %s4878_s3 }
  0x13   :  { %5451 = sst [smem:[#allocation14_spill]] %s4883_s8 }
  0x14   :  { %5452 = sst [smem:[#allocation15_spill]] %s4888_s14 }
  0x15   :  { %5453 = sst [smem:[#allocation16_spill]] %s4893_s19 }
  0x16   :  { %s4908_s6 = sld [smem:[%s5434_s0 + %s4791_s1]]   ;;  %s4807_s1 = smov 29  }
  0x17   :  { %s4913_s12 = sld [smem:[%s5434_s0 + %s4792_s7]]   ;;  %s4796_s7 = smov 18  }
  0x18   :  { %s4918_s20 = sld [smem:[%s5434_s0 + %s4793_s15]]   ;;  %s4797_s15 = smov 19  }
  0x19   :  { %s4923_s27 = sld [smem:[%s5434_s0 + %s4794_s22]]   ;;  %s4798_s22 = smov 20  }
  0x1a   :  { %s4928_s4 = sld [smem:[%s5434_s0 + %s4795_s28]]   ;;  %s4799_s28 = smov 21  }
  0x1b   :  { %s4933_s17 = sld [smem:[%s5434_s0 + %s4796_s7]]   ;;  %s4800_s7 = smov 22  }
  0x1c   :  { %5454 = sst [smem:[#allocation17_spill]] %s4908_s6 }
  0x1d   :  { %5455 = sst [smem:[#allocation18_spill]] %s4913_s12 }
  0x1e   :  { %5456 = sst [smem:[#allocation19_spill]] %s4918_s20 }
  0x1f   :  { %s4938_s13 = sld [smem:[%s5434_s0 + %s4797_s15]]   ;;  %s4801_s15 = smov 23  }
  0x20   :  { %5457 = sst [smem:[#allocation20_spill]] %s4928_s4 }
  0x21   :  { %5458 = sst [smem:[#allocation21_spill]] %s4933_s17 }
  0x22   :  { %s4943_s20 = sld [smem:[%s5434_s0 + %s4798_s22]]   ;;  %s4802_s22 = smov 24  }
  0x23   :  { %s4948_s4 = sld [smem:[%s5434_s0 + %s4799_s28]]   ;;  %s4803_s28 = smov 25  }
  0x24   :  { %s4953_s17 = sld [smem:[%s5434_s0 + %s4800_s7]]   ;;  %s4804_s7 = smov 26  }
  0x25   :  { %5459 = sst [smem:[#allocation22_spill]] %s4938_s13 }
  0x26   :  { %s4958_s13 = sld [smem:[%s5434_s0 + %s4801_s15]]   ;;  %s4805_s15 = smov 27  }
  0x28   :  { %5460 = sst [smem:[#allocation23_spill]] %s4943_s20 }
  0x29   :  { %5461 = sst [smem:[#allocation24_spill]] %s4948_s4 }
  0x2a   :  { %5462 = sst [smem:[#allocation25_spill]] %s4953_s17 }
  0x2b   :  { %s4963_s20 = sld [smem:[%s5434_s0 + %s4802_s22]]  }
  0x2c   :  { %5463 = sst [smem:[#allocation26_spill]] %s4958_s13 }
  0x2d   :  { %s4968_s4 = sld [smem:[%s5434_s0 + %s4803_s28]]  }
  0x2e   :  { %s4973_s17 = sld [smem:[%s5434_s0 + %s4804_s7]]  }
  0x2f   :  { %s4128_s13 = sld [smem:[%s5434_s0 + %s4805_s15]]  }
  0x31   :  { %5464 = sst [smem:[#allocation27_spill]] %s4963_s20 }
  0x32   :  { %s4981_s20 = sld [smem:[%s5434_s0 + %s4806_s23]]  }
  0x33   :  { %5465 = sst [smem:[#allocation28_spill]] %s4968_s4 }
  0x34   :  { %5466 = sst [smem:[#allocation29_spill]] %s4973_s17 }
  0x35   :  { %s4986_s4 = sld [smem:[%s5434_s0 + %s4807_s1]]   ;;  %v67_v0 = vstv %s4128_s13 }
  0x36   :  { %s4991_s17 = sld [smem:[%s5434_s0 + %s4808_s10]]   ;;  %68 = vst [vmem:[#allocation2] sm:$0x1] %v67_v0 }
  0x38   :  { %5467 = sst [smem:[#allocation30_spill]] %s4981_s20 }
  0x3c   :  { %5468 = sst [smem:[#allocation31_spill]] %s4991_s17 }
  0x3d   :  { %69 = vsyncpa [#allocation4], 0 }
  0x3e   :  { %71 = vsyncpa [#allocation4 + $0x1], 0 }
  0x3f   :  { %72 = vsyncpa [#allocation6], 0 }
  0x40   :  { %74 = vsyncpa [#allocation6 + $0x1], 0  ;;  %s4993_s15 = smov 0   ;;  %s4995_s16 = smov 0  }
  0x41   :  { %s4997_s18 = smov 0   ;;  %s4999_s23 = smov 0  }
  0x42 LB: > { %s5469_s20 = sld [smem:[#allocation30_spill]]  ;;  %s5470_s9 = sld [smem:[#allocation10_spill]]  ;;  %s4769_s16 = sphi %s4995_s16, %s5496_s16   ;;  %s4765_s15 = sphi %s4993_s15, %s5495_s15   ;;  %s4777_s23 = sphi %s4999_s23, %s5498_s23   ;;  %s4773_s18 = sphi %s4997_s18, %s5497_s18  }
  0x43   : > { %s5014_s0 = sadd.s32 4294967295, %s4777_s23   ;;  %s4133_s13 = sadd.s32 4294967294, %s4777_s23  }
  0x44   : > { %s5018_s22 = sadd.s32 1, %s4777_s23   ;;  %s765_s26 = sadd.s32 1, %s4773_s18 }
  0x45   : > { %s762_s1 = ssub.s32 %s4777_s23, %s5018_s22  ;;  %p775_p0 = scmp.ne.s32.totalorder %s4773_s18, %s4769_s16 }
  0x46   : > { %p763_p1 = scmp.eq.s32.totalorder %s762_s1, 0  ;;  %p776_p2 = scmp.eq.s32.totalorder %s5014_s0, 1 }
  0x47   : > { %p781_p3 = scmp.ne.s32.totalorder %s4769_s16, %s4765_s15  ;;  %p782_p4 = scmp.eq.s32.totalorder %s4133_s13, 1 }
  0x48   : > { %s5029_s28 = scalar_select %p763_p1, %s4773_s18, %s765_s26  }
  0x49   : > { %p5031_p5 = por %p776_p2, %p775_p0  ;;  %p5035_p6 = por %p782_p4, %p781_p3 }
  0x4a   : > { %p4136_p7 = scmp.ge.s32.totalorder %s4777_s23, 1  ;;  %p1002_p8 = scmp.lt.s32.totalorder %s4777_s23, 3 }
  0x4c   : > { %p1003_p9 = pnand %p4136_p7, %p1002_p8 }
  0x4d   : > { %p1151_p10 = scmp.lt.s32.totalorder (!%p1003_p9), %s5014_s0, 1  ;;  %v4809_v1 = vmov (!%p1003_p9), 0.0|0.0   ;;  %vm4810_vm0 = vmmov (!%p1003_p9), 0   ;;  %v4811_v2 = vmov (!%p1003_p9), 0.0   ;;  %s5473_s5 = sld [smem:[#allocation9_spill]] (!%p1003_p9)  ;;  %vm1237_vm1 = vcmask (!%p1003_p9), 1043456  }
  0x4e   : > { %1006 = sbr.rel (%p1003_p9) target bundleno = 4529 (0x11b1), region = 132  ;;  %4453 = vmatprep.subr.bf16.mxu0 (!%p1003_p9), %v4809_v1  ;;  %4300 = vmatprep.mubr.msk.f32.mxu0 (!%p1003_p9), %vm4810_vm0, %v4811_v2  ;;  %vm1233_vm2 = vcmask (!%p1003_p9), 162816   ;;  %s5474_s3 = sld [smem:[#allocation13_spill]] (!%p1003_p9)  ;;  %v1311_v11 = vld [vmem:[%s5470_s9] sm:$0xff] (!%p1003_p9)  ;;  %vm1323_vm3 = vcmask (!%p1003_p9), 195584   ;;  %vm1417_vm4 = vcmask (!%p1003_p9), 1040384  }
  0x4f   : > { %4319 = vmatprep.subr.mxu1 (!%p1003_p9), %v4811_v2  ;;  %4321 = vmatprep.mubr.msk.f32.mxu1 (!%p1003_p9), %vm4810_vm0, %v4811_v2  ;;  %v1312_v13 = vld [vmem:[%s5470_s9 + $0x8] sm:$0x3f] (!%p1003_p9)  ;;  %vm1412_vm5 = vcmask (!%p1003_p9), 1041408   ;;  %vm1422_vm6 = vcmask (!%p1003_p9), 130048   ;;  %s5475_s19 = sld [smem:[#allocation16_spill]] (!%p1003_p9)  ;;  %s5476_s17 = sld [smem:[#allocation31_spill]] (!%p1003_p9) }
  0x50   : > { %s5477_s8 = sld [smem:[#allocation14_spill]] (!%p1003_p9)  ;;  %s5478_s14 = sld [smem:[#allocation15_spill]] (!%p1003_p9)  ;;  %vm1559_vm7 = vcmask (!%p1003_p9), 31744   ;;  %vm1635_vm8 = vcmask (!%p1003_p9), 64512   ;;  %vm2235_vm9 = vcmask (!%p1003_p9), 97280   ;;  %vm3205_vm12 = vcmask (!%p1003_p9), 523264  }
  0x51   : > { %s4816_s9 = smov (!%p1003_p9), 104   ;;  %s5479_s6 = sld [smem:[#allocation17_spill]] (!%p1003_p9)  ;;  %vm3353_vm13 = vcmask (!%p1003_p9), 1046528  }
  0x52   : > { %s5480_s12 = sld [smem:[#allocation18_spill]] (!%p1003_p9)  ;;  %p4199_p11 = scmp.ne.s32.totalorder (!%p1003_p9), %s5014_s0, 0 }
  0x53   : > { %v1222_v10 = vld [vmem:[%s5473_s5] sm:$0x3] (!%p1003_p9)  ;;  %s4814_s5 = smov (!%p1003_p9), 124  }
  0x55   : > { %s5045_s7 = scalar_select %p1151_p10, %s5014_s0, 1 }
  0x56   : > { %vm4827_vm14 = vmmov (!%p4199_p11), 0  }
  0x57   : > { %s4498_s11 = smul.u32 24, %s5045_s7  ;;  %s1158_s1 = scalar_lea.vmem %s4868_s25, %s5045_s7 }
  0x58   : > { %v4151_v16 = vld [vmem:[%s1158_s1] ss:$0 sm:$0xff] }
  0x59   : > { %s1155_s13 = scalar_lea.vmem %s4863_s21, %s4498_s11  ;;  %s1163_s26 = scalar_lea.vmem %s4873_s29, %s4498_s11 }
  0x5a   : > { %v1223_v3 = vld [vmem:[%s1155_s13] sm:$0xff]  ;;  %v1224_v4 = vld [vmem:[%s1155_s13 + $0x8] sm:$0xff]  ;;  %v1225_v8 = vld [vmem:[%s1155_s13 + $0x10] sm:$0xf]  ;;  %s1166_s11 = scalar_lea.vmem %s5474_s3, %s5045_s7  ;;  %s5076_s13 = sshll.u32 %s5045_s7, 4 }
  0x5b   : > { %v4454_v5 = vpack.c.bf16 %v1224_v4, %v1223_v3  ;;  %v1313_v6 = vld [vmem:[%s1163_s26] sm:$0xff]  ;;  %v1314_v7 = vld [vmem:[%s1163_s26 + $0x8] sm:$0xff]  ;;  %v1315_v12 = vld [vmem:[%s1163_s26 + $0x10] sm:$0xff]  ;;  %s1177_s26 = scalar_lea.vmem %s5475_s19, %s5076_s13  ;;  %s5082_s1 = scalar_lea.vmem %s5476_s17, %s5076_s13 }
  0x5c   : > { %v4456_v9 = vpack.c.bf16 %v1314_v7, %v1313_v6  ;;  %v4154_v17 = vld [vmem:[%s1166_s11] ss:$0 sm:$0xff]  ;;  %v1467_v43 = vld [vmem:[%s1177_s26 + $0x8] sm:$0xff]  ;;  %s1169_s11 = scalar_lea.vmem %s5477_s8, %s5045_s7  ;;  %s1172_s3 = scalar_lea.vmem %s5478_s14, %s5045_s7 }
  0x5d   : > { %4455 = vmatpush3.bf16.msra.mxu0 %v4454_v5  ;;  %v1466_v42 = vld [vmem:[%s1177_s26] sm:$0xff]  ;;  %s1180_s26 = scalar_lea.vmem %s4898_s24, %s5045_s7  ;;  %s4815_s8 = smov 120  }
  0x5e   : > { %4298 = vmatprep.subr.mxu0 %v4811_v2  ;;  %v4460_v44 = vpack.c.bf16 %v1467_v43, %v1466_v42  ;;  %v4157_v52 = vld [vmem:[%s1169_s11] ss:$0 sm:$0xff]  ;;  %s4813_s11 = smov 112   ;;  %s4818_s14 = smov 100  }
  0x5f   : > { %v4158_v54 = vld [vmem:[%s1172_s3] ss:$0 sm:$0xff]  ;;  %s4812_s3 = smov 108  }
  0x60   : > { %v4159_v61 = vld [vmem:[%s1180_s26] ss:$0 sm:$0xff]  ;;  %s4817_s26 = smov 116  }
  0x61   : > { %4299 = vmatpush3.msk.msra.mxu0 %vm1237_vm1, %v1225_v8 }
  0x62   : > { %4301 = vmatmul.mubr.msk.f32.vlgmr.msra.gmra.mrb[0].mxu0 %vm1233_vm2, %v1222_v10  ;;  %4457 = vmatprep.subr.bf16.mxu0 %v4456_v9  ;;  %vm3550_vm2 = vcmask (!%p4199_p11), 22528  }
  0x63   : > { %4459 = vmatpush3.bf16.msra.mxu0 %v4456_v9  ;;  %4309 = vmatprep.mubr.msk.f32.mxu0 %vm1323_vm3, %v1311_v11 }
  0x64   : > { %4307 = vmatprep.subr.mxu0 %v1315_v12 }
  0x67   : > { %4308 = vmatpush3.msra.mxu0 %v1315_v12 }
  0x68   : > { %4310 = vmatmul.mubr.msk.f32.vlgmr.msra.gmra.mrb[2].mxu0 %vm1323_vm3, %v1312_v13  ;;  %4461 = vmatprep.subr.bf16.mxu0 %v4460_v44  ;;  %vm3598_vm3 = vcmask (!%p4199_p11), 33793  }
  0x69   : > { %4463 = vmatpush3.bf16.msra.mxu0 %v4460_v44 }
  0x6a   : > { %4324 = vmatprep.subr.mxu0 %v4811_v2 }
 0x135   : > { %v1307_v14 = vpop.f32.mrb[0].mxu0 }
 0x136   : > { %v4302_v15 = vpop.f32.mrb[1].mxu0  ;;  %v1308_v19 = vadd.f32 %v4151_v16, %v1307_v14 }
 0x138   : > { %v1409_v26 = vrot.slane %v1308_v19, 1 }
 0x13b   : > { %v4311_v18 = vpop.f32.mrb[2].mxu0 }
 0x13c   : > { %v1402_v20 = vadd.f32 %v4311_v18, %v4154_v17  ;;  %v1396_v21 = vpop.f32.mrb[3].mxu0 }
 0x13d   : > { %v1397_v22 = vadd.f32 %v4154_v17, %v1396_v21 }
 0x13e   : > { %v1414_v23 = vrot.slane %v1402_v20, 6 }
 0x13f   : > { %v1406_v24 = vrot.slane %v1397_v22, 7  ;;  %v1413_v25 = vrot.slane %v1397_v22, 6 }
 0x141   : > { %v5062_v27 = vsel %vm1417_vm4, %v1308_v19, %v1406_v24  ;;  %v1415_v28 = vsel %vm1412_vm5, %v1413_v25, %v1414_v23 }
 0x142   : > { %v1423_v29 = vsel %vm1422_vm6, %v5062_v27, 0.0  ;;  %v5067_v30 = vsel %vm1417_vm4, %v1409_v26, %v1415_v28 }
 0x143   : > { %1424 = vadd.xlane.f32.xlu0 %v1423_v29  ;;  %v1426_v31 = vsel %vm1422_vm6, %v5067_v30, 0.0 }
 0x147   : > { %1427 = vadd.xlane.f32.xlu0 %v1426_v31 }
 0x1d0   : > { %v1425_v32 = vpop.xlane.xlu0 %1424 }
 0x1d1   : > { %v1430_v33 = vmul.f32 0.0625, %v1425_v32 }
 0x1d3   : > { %v1432_v34 = vsub.f32 %v5062_v27, %v1430_v33 }
 0x1d4   : > { %v1428_v35 = vpop.xlane.xlu0 %1427 }
 0x1d5   : > { %v1431_v36 = vmul.f32 0.0625, %v1428_v35  ;;  %v1434_v37 = vmul.f32 %v1432_v34, %v1432_v34 }
 0x1d7   : > { %v1433_v38 = vsub.f32 %v5067_v30, %v1431_v36  ;;  %v1436_v39 = vsel %vm1422_vm6, %v1434_v37, 0.0 }
 0x1d8   : > { %1437 = vadd.xlane.f32.xlu1 %v1436_v39 }
 0x1d9   : > { %v1435_v40 = vmul.f32 %v1433_v38, %v1433_v38 }
 0x1db   : > { %v1439_v41 = vsel %vm1422_vm6, %v1435_v40, 0.0 }
 0x1dc   : > { %1440 = vadd.xlane.f32.xlu1 %v1439_v41 }
 0x265   : > { %v1438_v45 = vpop.xlane.xlu1 %1437 }
 0x266   : > { %v1442_v46 = vmul.f32 0.0625, %v1438_v45 }
 0x268   : > { %v1444_v47 = vadd.f32 1e-05, %v1442_v46 }
 0x269   : > { %v1441_v48 = vpop.xlane.xlu1 %1440 }
 0x26a   : > { %4617 = vrsqrt.f32 %v1444_v47  ;;  %v1443_v49 = vmul.f32 0.0625, %v1441_v48 }
 0x26c   : > { %v1445_v50 = vadd.f32 1e-05, %v1443_v49 }
 0x26e   : > { %4619 = vrsqrt.f32 %v1445_v50 }
 0x274   : > { %v4618_v51 = vpop.eup %4617 }
 0x275   : > { %v1448_v53 = vmul.f32 %v4618_v51, %v1432_v34 }
 0x277   : > { %v1456_v55 = vmul.f32 %v4157_v52, %v1448_v53 }
 0x278   : > { %v4620_v56 = vpop.eup %4619 }
 0x279   : > { %v1449_v57 = vmul.f32 %v4620_v56, %v1433_v38  ;;  %v1464_v58 = vadd.f32 %v4158_v54, %v1456_v55 }
 0x27b   : > { %v1457_v59 = vmul.f32 %v4157_v52, %v1449_v57  ;;  %4316 = vmatprep.mubr.msk.f32.mxu0 %vm1422_vm6, %v1464_v58 }
 0x27d   : > { %v1465_v60 = vadd.f32 %v4158_v54, %v1457_v59 }
 0x27f   : > { %4317 = vmatmul.mubr.msk.f32.vlgmr.msra.gmra.mrb[4].mxu0 %vm1422_vm6, %v1465_v60 }
 0x280   : > { %4326 = vmatprep.mubr.msk.f32.mxu0 %vm4810_vm0, %v4811_v2 }
 0x352   : > { %v4318_v62 = vpop.f32.mrb[4].mxu0 }
 0x353   : > { %v1547_v63 = vpop.f32.mrb[5].mxu0  ;;  %v5103_v1 = vadd.f32 %v4318_v62, %v4159_v61 }
 0x354   : > { %v5095_v0 = vadd.f32 %v4159_v61, %v1547_v63 }
 0x356   : > { %1725 = vrot.lane.b32.xlu1 %v5095_v0, %s4812_s3  ;;  %1557 = vrot.lane.b32.xlu0 %v5095_v0, %s4813_s11 }
 0x35a   : > { %1723 = vrot.lane.b32.xlu1 %v5095_v0, %s4814_s5  ;;  %1889 = vrot.lane.b32.xlu0 %v5095_v0, %s4815_s8 }
 0x35e   : > { %1891 = vrot.lane.b32.xlu1 %v5095_v0, %s4816_s9  ;;  %2055 = vrot.lane.b32.xlu0 %v5095_v0, %s4817_s26 }
 0x362   : > { %2057 = vrot.lane.b32.xlu1 %v5095_v0, %s4818_s14  ;;  %2404 = vrot.lane.b32.xlu0 %v5103_v1, %s4812_s3  ;;  %s4823_s3 = smov 4  }
 0x366   : > { %2238 = vrot.lane.b32.xlu1 %v5103_v1, %s4813_s11  ;;  %2570 = vrot.lane.b32.xlu0 %v5103_v1, %s4816_s9  ;;  %s4820_s9 = smov 88   ;;  %s5440_s11 = smov 8  }
 0x36a   : > { %2402 = vrot.lane.b32.xlu1 %v5103_v1, %s4814_s5  ;;  %2736 = vrot.lane.b32.xlu0 %v5103_v1, %s4818_s14  ;;  %s4819_s5 = smov 96   ;;  %s4822_s14 = smov 92  }
 0x36e   : > { %2568 = vrot.lane.b32.xlu1 %v5103_v1, %s4815_s8  ;;  %s4821_s8 = smov 84  }
 0x372   : > { %2734 = vrot.lane.b32.xlu1 %v5103_v1, %s4817_s26  ;;  %s1185_s26 = scalar_lea.vmem %s4903_s30, %s5076_s13 }
 0x3c8   : > { %v1726_v3 = vpop.permute.xlu1 %1725  ;;  %v1558_v4 = vpop.permute.xlu0 %1557 }
 0x3c9   : > { %4320 = vmatpush3.xpose.msk.msra.mxu1 %vm1559_vm7, %v1558_v4 }
 0x3ca   : > { %4329 = vmatprep.subr.mxu1 %v4811_v2 }
 0x3cc   : > { %v1724_v5 = vpop.permute.xlu1 %1723  ;;  %4322 = vmatmul.mubr.msk.f32.vlgmr.msra.gmra.mrb[0].mxu1 %vm1559_vm7, %v5095_v0  ;;  %v1890_v6 = vpop.permute.xlu0 %1889 }
 0x3cd   : > { %4330 = vmatpush3.xpose.msk.msra.mxu1 %vm1559_vm7, %v1726_v3  ;;  %4331 = vmatprep.mubr.msk.f32.mxu1 %vm4810_vm0, %v4811_v2 }
 0x3ce   : > { %4339 = vmatprep.subr.mxu1 %v4811_v2 }
 0x3d0   : > { %v1892_v7 = vpop.permute.xlu1 %1891  ;;  %4332 = vmatmul.mubr.msk.f32.vlgmr.msra.gmra.mrb[2].mxu1 %vm1559_vm7, %v1724_v5  ;;  %v2056_v8 = vpop.permute.xlu0 %2055 }
 0x3d1   : > { %4340 = vmatpush3.xpose.msk.msra.mxu1 %vm1559_vm7, %v1892_v7  ;;  %4341 = vmatprep.mubr.msk.f32.mxu1 %vm4810_vm0, %v4811_v2 }
 0x3d2   : > { %4349 = vmatprep.subr.mxu1 %v4811_v2 }
 0x3d4   : > { %v2058_v9 = vpop.permute.xlu1 %2057  ;;  %4342 = vmatmul.mubr.msk.f32.vlgmr.msra.gmra.mrb[4].mxu1 %vm1559_vm7, %v1890_v6  ;;  %v2405_v10 = vpop.permute.xlu0 %2404 }
 0x3d5   : > { %4350 = vmatpush3.xpose.msk.msra.mxu1 %vm1559_vm7, %v2058_v9  ;;  %4351 = vmatprep.mubr.msk.f32.mxu1 %vm4810_vm0, %v4811_v2 }
 0x3d6   : > { %4359 = vmatprep.subr.mxu1 %v4811_v2 }
 0x3d8   : > { %v2239_v11 = vpop.permute.xlu1 %2238  ;;  %4352 = vmatmul.mubr.msk.f32.vlgmr.msra.gmra.mrb[6].mxu1 %vm1559_vm7, %v2056_v8  ;;  %v2571_v13 = vpop.permute.xlu0 %2570 }
 0x3d9   : > { %4360 = vmatpush3.xpose.msk.msra.mxu1 %vm1559_vm7, %v2239_v11  ;;  %4361 = vmatprep.mubr.msk.f32.mxu1 %vm4810_vm0, %v4811_v2 }
 0x3da   : > { %4369 = vmatprep.subr.mxu1 %v4811_v2 }
 0x3dc   : > { %v2403_v12 = vpop.permute.xlu1 %2402  ;;  %4362 = vmatmul.mubr.msk.f32.vlgmr.msra.gmra.mrb[8].mxu1 %vm1559_vm7, %v5103_v1  ;;  %v2737_v15 = vpop.permute.xlu0 %2736 }
 0x3dd   : > { %4370 = vmatpush3.xpose.msk.msra.mxu1 %vm1559_vm7, %v2405_v10  ;;  %4371 = vmatprep.mubr.msk.f32.mxu1 %vm4810_vm0, %v4811_v2 }
 0x3de   : > { %4379 = vmatprep.subr.mxu1 %v4811_v2 }
 0x3e0   : > { %4372 = vmatmul.mubr.msk.f32.vlgmr.msra.gmra.mrb[10].mxu1 %vm1559_vm7, %v2403_v12  ;;  %v2569_v14 = vpop.permute.xlu1 %2568 }
 0x3e1   : > { %4380 = vmatpush3.xpose.msk.msra.mxu1 %vm1559_vm7, %v2571_v13  ;;  %4381 = vmatprep.mubr.msk.f32.mxu1 %vm4810_vm0, %v4811_v2 }
 0x3e2   : > { %4389 = vmatprep.subr.mxu1 %v4811_v2 }
 0x3e4   : > { %4382 = vmatmul.mubr.msk.f32.vlgmr.msra.gmra.mrb[12].mxu1 %vm1559_vm7, %v2569_v14  ;;  %v2735_v16 = vpop.permute.xlu1 %2734 }
 0x3e5   : > { %4390 = vmatpush3.xpose.msk.msra.mxu1 %vm1559_vm7, %v2737_v15  ;;  %4391 = vmatprep.mubr.msk.f32.mxu1 %vm4810_vm0, %v4811_v2 }
 0x3e8   : > { %4392 = vmatmul.mubr.msk.f32.vlgmr.msra.gmra.mrb[14].mxu1 %vm1559_vm7, %v2735_v16 }
 0x49f   : > { %v1630_v17 = vpop.f32.mrb[0].mxu1 }
 0x4a0   : > { %v1634_v18 = vmul.f32 0.5, %v1630_v17  ;;  %v4323_v19 = vpop.f32.mrb[1].mxu1 }
 0x4a2   : > { %v1636_v20 = vsel %vm1635_vm8, %v1634_v18, -inf }
 0x4a3   : > { %1637 = vmax.xlane.f32.xlu0 %v1636_v20  ;;  %v1797_v21 = vpop.f32.mrb[2].mxu1 }
 0x4a4   : > { %v1801_v22 = vmul.f32 0.5, %v1797_v21  ;;  %v4333_v23 = vpop.f32.mrb[3].mxu1 }
 0x4a6   : > { %v1802_v24 = vsel %vm1635_vm8, %v1801_v22, -inf }
 0x4a7   : > { %1803 = vmax.xlane.f32.xlu1 %v1802_v24  ;;  %v1963_v25 = vpop.f32.mrb[4].mxu1 }
 0x4a8   : > { %v5154_v26 = vmul.f32 0.5, %v1963_v25  ;;  %v4343_v28 = vpop.f32.mrb[5].mxu1 }
 0x4aa   : > { %v1968_v29 = vsel %vm1635_vm8, %v5154_v26, -inf }
 0x4ab   : > { %1969 = vmax.xlane.f32.xlu0 %v1968_v29  ;;  %v2129_v31 = vpop.f32.mrb[6].mxu1 }
 0x4ac   : > { %v2133_v32 = vmul.f32 0.5, %v2129_v31  ;;  %v4353_v33 = vpop.f32.mrb[7].mxu1 }
 0x4ae   : > { %v2134_v34 = vsel %vm1635_vm8, %v2133_v32, -inf }
 0x4af   : > { %2135 = vmax.xlane.f32.xlu0 %v2134_v34  ;;  %v2310_v35 = vpop.f32.mrb[8].mxu1 }
 0x4b0   : > { %v2314_v36 = vmul.f32 0.5, %v2310_v35  ;;  %v4363_v37 = vpop.f32.mrb[9].mxu1 }
 0x4b2   : > { %v2315_v38 = vsel %vm1635_vm8, %v2314_v36, -inf }
 0x4b3   : > { %2316 = vmax.xlane.f32.xlu0 %v2315_v38  ;;  %v2476_v39 = vpop.f32.mrb[10].mxu1 }
 0x4b4   : > { %v2480_v40 = vmul.f32 0.5, %v2476_v39  ;;  %v4373_v41 = vpop.f32.mrb[11].mxu1 }
 0x4b6   : > { %v2481_v42 = vsel %vm1635_vm8, %v2480_v40, -inf }
 0x4b7   : > { %2482 = vmax.xlane.f32.xlu1 %v2481_v42  ;;  %v2642_v43 = vpop.f32.mrb[12].mxu1 }
 0x4b8   : > { %v2646_v44 = vmul.f32 0.5, %v2642_v43  ;;  %v4383_v45 = vpop.f32.mrb[13].mxu1 }
 0x4ba   : > { %v2647_v46 = vsel %vm1635_vm8, %v2646_v44, -inf }
 0x4bb   : > { %2648 = vmax.xlane.f32.xlu0 %v2647_v46  ;;  %v2808_v47 = vpop.f32.mrb[14].mxu1 }
 0x4bc   : > { %v4393_v48 = vpop.f32.mrb[15].mxu1  ;;  %v2812_v49 = vmul.f32 0.5, %v2808_v47 }
 0x4be   : > { %v2813_v50 = vsel %vm1635_vm8, %v2812_v49, -inf }
 0x4c8   : > { %1647 = vrot.lane.b32.xlu1 %v5095_v0, %s4819_s5 }
 0x4ec   : > { %2814 = vmax.xlane.f32.xlu1 %v2813_v50 }
 0x4fd   : > { %1979 = vrot.lane.b32.xlu1 %v5095_v0, %s4820_s9 }
 0x501   : > { %2145 = vrot.lane.b32.xlu1 %v5095_v0, %s4821_s8 }
 0x505   : > { %2326 = vrot.lane.b32.xlu1 %v5103_v1, %s4819_s5  ;;  %s4825_s5 = smov 12  }
 0x530   : > { %v1638_v51 = vpop.xlane.xlu0 %1637 }
 0x531   : > { %v1639_v52 = vsub.f32 %v1634_v18, %v1638_v51 }
 0x533   : > { %v1640_v53 = vmul.f32 1.442695, %v1639_v52 }
 0x534   : > { %v1804_v54 = vpop.xlane.xlu1 %1803 }
 0x535   : > { %4621 = vpow2.f32 %v1640_v53  ;;  %v1805_v55 = vsub.f32 %v1801_v22, %v1804_v54 }
 0x537   : > { %v1806_v56 = vmul.f32 1.442695, %v1805_v55 }
 0x538   : > { %v1970_v57 = vpop.xlane.xlu0 %1969 }
 0x539   : > { %4623 = vpow2.f32 %v1806_v56  ;;  %v1971_v8 = vsub.f32 %v5154_v26, %v1970_v57 }
 0x53b   : > { %v1972_v10 = vmul.f32 1.442695, %v1971_v8  ;;  %v2916_v8 = vld [vmem:[%s1185_s26 + $0x8] sm:$0xff] }
 0x53c   : > { %v2136_v58 = vpop.xlane.xlu0 %2135 }
 0x53d   : > { %v2137_v59 = vsub.f32 %v2133_v32, %v2136_v58 }
 0x53f   : > { %v4622_v60 = vpop.eup %4621  ;;  %v2138_v61 = vmul.f32 1.442695, %v2137_v59 }
 0x540   : > { %v1642_v62 = vsel %vm1635_vm8, %v4622_v60, 0.0  ;;  %v2317_v9 = vpop.xlane.xlu0 %2316 }
 0x541   : > { %4625 = vpow2.f32 %v2138_v61  ;;  %1643 = vadd.xlane.f32.xlu0 %v1642_v62  ;;  %v2318_v11 = vsub.f32 %v2314_v36, %v2317_v9 }
 0x542   : > { %4627 = vpow2.f32 %v1972_v10 }
 0x543   : > { %v4624_v63 = vpop.eup %4623  ;;  %v2319_v13 = vmul.f32 1.442695, %v2318_v11 }
 0x544   : > { %v2483_v3 = vpop.xlane.xlu1 %2482  ;;  %v1808_v4 = vsel %vm1635_vm8, %v4624_v63, 0.0 }
 0x545   : > { %1809 = vadd.xlane.f32.xlu1 %v1808_v4  ;;  %4629 = vpow2.f32 %v2319_v13  ;;  %v2484_v15 = vsub.f32 %v2480_v40, %v2483_v3 }
 0x547   : > { %v2485_v17 = vmul.f32 1.442695, %v2484_v15 }
 0x548   : > { %v1648_v5 = vpop.permute.xlu1 %1647  ;;  %v2649_v12 = vpop.xlane.xlu0 %2648 }
 0x549   : > { %4325 = vmatpush3.msra.mxu0 %v1648_v5  ;;  %v2650_v14 = vsub.f32 %v2646_v44, %v2649_v12 }
 0x54a   : > { %4334 = vmatprep.subr.mxu0 %v4811_v2 }
 0x54b   : > { %v5172_v6 = vpop.eup %4625  ;;  %v2651_v16 = vmul.f32 1.442695, %v2650_v14 }
 0x54c   : > { %v2140_v7 = vsel %vm1635_vm8, %v5172_v6, 0.0  ;;  %v4628_v18 = vpop.eup %4627 }
 0x54d   : > { %2141 = vadd.xlane.f32.xlu1 %v2140_v7  ;;  %4631 = vpow2.f32 %v2651_v16  ;;  %v2915_v7 = vld [vmem:[%s1185_s26] sm:$0xff]  ;;  %s1191_s26 = scalar_lea.vmem %s5480_s12, %s5045_s7 }
 0x54e   : > { %4633 = vpow2.f32 %v2485_v17 }
 0x54f   : > { %v4630_v19 = vpop.eup %4629 }
 0x550   : > { %v2321_v21 = vsel %vm1635_vm8, %v4630_v19, 0.0 }
 0x557   : > { %1813 = vrot.lane.b32.xlu0 %v5095_v0, %s4822_s14  ;;  %v1974_v0 = vsel %vm1635_vm8, %v4628_v18, 0.0  ;;  %v5181_v22 = vpop.eup %4631 }
 0x558   : > { %v2653_v25 = vsel %vm1635_vm8, %v5181_v22, 0.0  ;;  %v4634_v26 = vpop.eup %4633 }
 0x559   : > { %v2487_v28 = vsel %vm1635_vm8, %v4634_v26, 0.0 }
 0x55e   : > { %2492 = vrot.lane.b32.xlu1 %v5103_v1, %s4822_s14  ;;  %s1199_s14 = scalar_lea.vmem %s4923_s27, %s5076_s13  ;;  %s4218_s13 = sshll.u32 %s5045_s7, 6 }
 0x576   : > { %1975 = vadd.xlane.f32.xlu0 %v1974_v0 }
 0x579   : > { %v2815_v20 = vpop.xlane.xlu1 %2814 }
 0x57a   : > { %v2816_v23 = vsub.f32 %v2812_v49, %v2815_v20  ;;  %2322 = vadd.xlane.f32.xlu0 %v2321_v21 }
 0x57c   : > { %v2817_v24 = vmul.f32 1.442695, %v2816_v23 }
 0x57d   : > { %v1980_v32 = vpop.permute.xlu1 %1979 }
 0x57e   : > { %4635 = vpow2.f32 %v2817_v24  ;;  %2654 = vadd.xlane.f32.xlu0 %v2653_v25 }
 0x581   : > { %v2146_v33 = vpop.permute.xlu1 %2145 }
 0x582   : > { %2488 = vadd.xlane.f32.xlu1 %v2487_v28 }
 0x585   : > { %v2327_v34 = vpop.permute.xlu1 %2326 }
 0x588   : > { %v5186_v29 = vpop.eup %4635 }
 0x589   : > { %v2819_v31 = vsel %vm1635_vm8, %v5186_v29, 0.0 }
 0x58a   : > { %2820 = vadd.xlane.f32.xlu0 %v2819_v31 }
 0x593   : > { %2824 = vrot.lane.b32.xlu1 %v5103_v1, %s4821_s8  ;;  %s5481_s8 = sld [smem:[#allocation19_spill]] }
 0x5a0   : > { %2658 = vrot.lane.b32.xlu0 %v5103_v1, %s4820_s9  ;;  %s1188_s9 = scalar_lea.vmem %s5479_s6, %s5045_s7 }
 0x5ce   : > { %v1644_v35 = vpop.xlane.xlu0 %1643 }
 0x5cf   : > { %4637 = vrcp.f32 %v1644_v35 }
 0x5d2   : > { %v1810_v36 = vpop.xlane.xlu1 %1809  ;;  %v1814_v39 = vpop.permute.xlu0 %1813 }
 0x5d3   : > { %4639 = vrcp.f32 %v1810_v36 }
 0x5d9   : > { %v4638_v37 = vpop.eup %4637 }
 0x5da   : > { %v1646_v38 = vmul.f32 %v4638_v37, %v4622_v60  ;;  %v2142_v1 = vpop.xlane.xlu1 %2141 }
 0x5dc   : > { %4327 = vmatmul.mubr.msk.f32.vlgmr.msra.gmra.mrb[6].mxu0 %vm1635_vm8, %v1646_v38 }
 0x5dd   : > { %v4640_v40 = vpop.eup %4639  ;;  %4335 = vmatpush3.msra.mxu0 %v1814_v39  ;;  %4336 = vmatprep.mubr.msk.f32.mxu0 %vm4810_vm0, %v4811_v2 }
 0x5de   : > { %v1812_v41 = vmul.f32 %v4640_v40, %v4624_v63  ;;  %4344 = vmatprep.subr.mxu0 %v4811_v2  ;;  %v2493_v44 = vpop.permute.xlu1 %2492 }
 0x5e0   : > { %4337 = vmatmul.mubr.msk.f32.vlgmr.msra.gmra.mrb[8].mxu0 %vm1635_vm8, %v1812_v41 }
 0x5e1   : > { %4345 = vmatpush3.msra.mxu0 %v1980_v32  ;;  %4346 = vmatprep.mubr.msk.f32.mxu0 %vm4810_vm0, %v4811_v2 }
 0x5e2   : > { %4354 = vmatprep.subr.mxu0 %v4811_v2 }
 0x603   : > { %v1976_v42 = vpop.xlane.xlu0 %1975 }
 0x604   : > { %4641 = vrcp.f32 %v1976_v42 }
 0x605   : > { %4643 = vrcp.f32 %v2142_v1 }
 0x607   : > { %v2323_v43 = vpop.xlane.xlu0 %2322 }
 0x608   : > { %4645 = vrcp.f32 %v2323_v43 }
 0x60b   : > { %v2655_v47 = vpop.xlane.xlu0 %2654 }
 0x60e   : > { %v4642_v45 = vpop.eup %4641 }
 0x60f   : > { %v1978_v46 = vmul.f32 %v4642_v45, %v4628_v18  ;;  %v2489_v48 = vpop.xlane.xlu1 %2488  ;;  %v4644_v49 = vpop.eup %4643 }
 0x610   : > { %4647 = vrcp.f32 %v2489_v48  ;;  %v2144_v50 = vmul.f32 %v4644_v49, %v5172_v6  ;;  %v3053_v48 = vld [vmem:[%s1199_s14] sm:$0xff]  ;;  %v3054_v49 = vld [vmem:[%s1199_s14 + $0x8] sm:$0xff] }
 0x611   : > { %4347 = vmatmul.mubr.msk.f32.vlgmr.msra.gmra.mrb[10].mxu0 %vm1635_vm8, %v1978_v46  ;;  %4649 = vrcp.f32 %v2655_v47 }
 0x612   : > { %4355 = vmatpush3.msra.mxu0 %v2146_v33  ;;  %4356 = vmatprep.mubr.msk.f32.mxu0 %vm4810_vm0, %v4811_v2  ;;  %v4646_v51 = vpop.eup %4645  ;;  %v4188_v33 = vld [vmem:[%s1188_s9] ss:$0 sm:$0xff] }
 0x613   : > { %4364 = vmatprep.subr.mxu0 %v4811_v2  ;;  %v2325_v52 = vmul.f32 %v4646_v51, %v4630_v19  ;;  %v2825_v59 = vpop.permute.xlu1 %2824 }
 0x615   : > { %4357 = vmatmul.mubr.msk.f32.vlgmr.msra.gmra.mrb[12].mxu0 %vm1635_vm8, %v2144_v50  ;;  %v4468_v50 = vpack.c.bf16 %v3054_v49, %v3053_v48 }
 0x616   : > { %4365 = vmatpush3.msra.mxu0 %v2327_v34  ;;  %4366 = vmatprep.mubr.msk.f32.mxu0 %vm4810_vm0, %v4811_v2 }
 0x617   : > { %v2821_v53 = vpop.xlane.xlu0 %2820  ;;  %4374 = vmatprep.subr.mxu0 %v4811_v2 }
 0x618   : > { %4651 = vrcp.f32 %v2821_v53 }
 0x619   : > { %4367 = vmatmul.mubr.msk.f32.vlgmr.msra.gmra.mrb[14].mxu0 %vm1635_vm8, %v2325_v52 }
 0x61a   : > { %v4648_v54 = vpop.eup %4647  ;;  %4375 = vmatpush3.msra.mxu0 %v2493_v44  ;;  %4376 = vmatprep.mubr.msk.f32.mxu0 %vm4810_vm0, %v4811_v2 }
 0x61b   : > { %v2491_v55 = vmul.f32 %v4648_v54, %v4634_v26  ;;  %v2659_v56 = vpop.permute.xlu0 %2658  ;;  %4384 = vmatprep.subr.mxu0 %v4811_v2  ;;  %v4650_v57 = vpop.eup %4649 }
 0x61c   : > { %v2657_v58 = vmul.f32 %v4650_v57, %v5181_v22 }
 0x61d   : > { %4377 = vmatmul.mubr.msk.f32.vlgmr.msra.gmra.mrb[16].mxu0 %vm1635_vm8, %v2491_v55 }
 0x61e   : > { %4385 = vmatpush3.msra.mxu0 %v2659_v56  ;;  %4386 = vmatprep.mubr.msk.f32.mxu0 %vm4810_vm0, %v4811_v2 }
 0x61f   : > { %4394 = vmatprep.subr.mxu0 %v4811_v2 }
 0x621   : > { %4387 = vmatmul.mubr.msk.f32.vlgmr.msra.gmra.mrb[18].mxu0 %vm1635_vm8, %v2657_v58  ;;  %v4189_v58 = vld [vmem:[%s1191_s26] ss:$0 sm:$0xff] }
 0x622   : > { %v4652_v60 = vpop.eup %4651  ;;  %4395 = vmatpush3.msra.mxu0 %v2825_v59  ;;  %4396 = vmatprep.mubr.msk.f32.mxu0 %vm4810_vm0, %v4811_v2  ;;  %v4464_v2 = vpack.c.bf16 %v2916_v8, %v2915_v7  ;;  %vm3539_vm0 = vcmask (!%p4199_p11), 32768  }
 0x623   : > { %v2823_v61 = vmul.f32 %v4652_v60, %v5186_v29  ;;  %4469 = vmatprep.subr.bf16.mxu0 %v4468_v50 }
 0x624   : > { %4465 = vmatprep.subr.bf16.mxu1 %v4464_v2 }
 0x625   : > { %4397 = vmatmul.mubr.msk.f32.vlgmr.msra.gmra.mrb[20].mxu0 %vm1635_vm8, %v2823_v61  ;;  %4467 = vmatpush3.bf16.msra.mxu1 %v4464_v2 }
 0x626   : > { %4471 = vmatpush3.bf16.msra.mxu0 %v4468_v50 }
 0x6af   : > { %v1719_v62 = vpop.f32.mrb[6].mxu0 }
 0x6b0   : > { %v4328_v63 = vpop.f32.mrb[7].mxu0 }
 0x6b3   : > { %v1885_v3 = vpop.f32.mrb[8].mxu0 }
 0x6b4   : > { %2222 = vrot.lane.b32.xlu0 %v1885_v3, %s4823_s3  ;;  %v4338_v4 = vpop.f32.mrb[9].mxu0 }
 0x6e4   : > { %v2051_v5 = vpop.f32.mrb[10].mxu0 }
 0x6e5   : > { %2226 = vrot.lane.b32.xlu1 %v2051_v5, %s5440_s11  ;;  %v4348_v6 = vpop.f32.mrb[11].mxu0 }
 0x6e8   : > { %v2217_v9 = vpop.f32.mrb[12].mxu0 }
 0x6e9   : > { %2230 = vrot.lane.b32.xlu1 %v2217_v9, %s4825_s5  ;;  %v4358_v10 = vpop.f32.mrb[13].mxu0 }
 0x6ec   : > { %v2398_v11 = vpop.f32.mrb[14].mxu0 }
 0x6ed   : > { %v4368_v12 = vpop.f32.mrb[15].mxu0 }
 0x6f0   : > { %v2564_v13 = vpop.f32.mrb[16].mxu0 }
 0x6f1   : > { %2901 = vrot.lane.b32.xlu0 %v2564_v13, %s4823_s3  ;;  %v4378_v14 = vpop.f32.mrb[17].mxu0  ;;  %s5482_s3 = sld [smem:[#allocation21_spill]] }
 0x6f4   : > { %v2730_v15 = vpop.f32.mrb[18].mxu0 }
 0x6f5   : > { %2905 = vrot.lane.b32.xlu0 %v2730_v15, %s5440_s11  ;;  %v4388_v16 = vpop.f32.mrb[19].mxu0 }
 0x6f7   : > { %s1207_s9 = scalar_lea.vmem %s5482_s3, %s4218_s13  ;;  %s5484_s3 = sld [smem:[#allocation22_spill]] }
 0x6f8   : > { %v2896_v17 = vpop.f32.mrb[20].mxu0  ;;  %v3197_v6 = vld [vmem:[%s1207_s9] sm:$0xff]  ;;  %v3198_v7 = vld [vmem:[%s1207_s9 + $0x8] sm:$0xff]  ;;  %v3199_v9 = vld [vmem:[%s1207_s9 + $0x10] sm:$0xff]  ;;  %s5486_s13 = sld [smem:[#allocation24_spill]] }
 0x6f9   : > { %2909 = vrot.lane.b32.xlu1 %v2896_v17, %s4825_s5  ;;  %v4398_v18 = vpop.f32.mrb[21].mxu0  ;;  %s1194_s5 = scalar_lea.vmem %s5481_s8, %s5045_s7  ;;  %v4472_v8 = vpack.c.bf16 %v3198_v7, %v3197_v6  ;;  %s5483_s8 = sld [smem:[#allocation20_spill]]  ;;  %v3200_v2 = vld [vmem:[%s1207_s9 + $0x18] sm:$0xff]  ;;  %v3202_v12 = vld [vmem:[%s1207_s9 + $0x28] sm:$0xff]  ;;  %v3203_v14 = vld [vmem:[%s1207_s9 + $0x30] sm:$0xff] }
 0x6fa   : > { %v4190_v60 = vld [vmem:[%s1194_s5] ss:$0 sm:$0xff]  ;;  %v4476_v10 = vpack.c.bf16 %v3200_v2, %v3199_v9  ;;  %v3204_v15 = vld [vmem:[%s1207_s9 + $0x38] sm:$0xff]  ;;  %s5485_s5 = sld [smem:[#allocation23_spill]] }
 0x6fb   : > { %4473 = vmatprep.subr.bf16.mxu1 %v4472_v8  ;;  %v4484_v16 = vpack.c.bf16 %v3204_v15, %v3203_v14 }
 0x6fd   : > { %s1210_s26 = scalar_lea.vmem %s5484_s3, %s5045_s7 }
 0x6fe   : > { %s1216_s3 = scalar_lea.vmem %s5486_s13, %s5045_s7  ;;  %s5488_s13 = sld [smem:[#allocation27_spill]] (!%p4199_p11) }
 0x6ff   : > { %s1202_s14 = scalar_lea.vmem %s5483_s8, %s5045_s7 }
 0x700   : > { %v4191_v17 = vld [vmem:[%s1202_s14] ss:$0 sm:$0xff]  ;;  %s1213_s14 = scalar_lea.vmem %s5485_s5, %s5045_s7  ;;  %s5487_s5 = sld [smem:[#allocation25_spill]] (!%p4199_p11) }
 0x726   : > { %v2223_v0 = vpop.permute.xlu0 %2222 }
 0x727   : > { %v2233_v20 = vsel %vm1559_vm7, %v1719_v62, %v2223_v0 }
 0x757   : > { %v2227_v19 = vpop.permute.xlu1 %2226 }
 0x758   : > { %v2234_v21 = vsel %vm1635_vm8, %v2233_v20, %v2227_v19 }
 0x75b   : > { %v2231_v22 = vpop.permute.xlu1 %2230 }
 0x75c   : > { %v2236_v23 = vsel %vm2235_vm9, %v2234_v21, %v2231_v22 }
 0x75d   : > { %4403 = vmatprep.mubr.msk.f32.mxu1 %vm1422_vm6, %v2236_v23 }
 0x763   : > { %v2902_v24 = vpop.permute.xlu0 %2901 }
 0x764   : > { %v2912_v26 = vsel %vm1559_vm7, %v2398_v11, %v2902_v24  ;;  %v3201_v11 = vld [vmem:[%s1207_s9 + $0x20] sm:$0xff]  ;;  %s5272_s9 = sand.u32 1, %s4769_s16  }
 0x765   : > { %v4480_v13 = vpack.c.bf16 %v3202_v12, %v3201_v11  ;;  %v4196_v11 = vld [vmem:[%s1210_s26] ss:$0 sm:$0xff]  ;;  %s4138_s8 = sshll.u32 %s5272_s9, 1  ;;  %s4137_s26 = sshll.u32 %s5272_s9, 4 }
 0x766   : > { %s5280_s11 = scalar_lea.vmem [#allocation3], %s4137_s26  ;;  %s5292_s7 = scalar_lea.vmem [#allocation5], %s4138_s8 }
 0x767   : > { %v2906_v25 = vpop.permute.xlu0 %2905  ;;  %s5491_s26 = sld [smem:[#allocation28_spill]] (!%p4199_p11) }
 0x768   : > { %v2913_v28 = vsel %vm1635_vm8, %v2912_v26, %v2906_v25  ;;  %s5492_s8 = sld [smem:[#allocation12_spill]] (!%p4199_p11)  ;;  %vm3609_vm8 = vcmask (!%p4199_p11), 23559  }
 0x76b   : > { %v2910_v29 = vpop.permute.xlu1 %2909 }
 0x76c   : > { %v2914_v31 = vsel %vm2235_vm9, %v2913_v28, %v2910_v29  ;;  %vm3611_vm9 = vcmask (!%p4199_p11), 21504  }
 0x76d   : > { %4404 = vmatmul.mubr.msk.f32.vlgmr.msra.gmra.mrb[16].mxu1 %vm1422_vm6, %v2914_v31 }
 0x76e   : > { %4475 = vmatpush3.bf16.msra.mxu1 %v4472_v8 }
 0x76f   : > { %4477 = vmatprep.subr.bf16.mxu1 %v4476_v10 }
 0x772   : > { %4479 = vmatpush3.bf16.msra.mxu1 %v4476_v10 }
 0x773   : > { %4481 = vmatprep.subr.bf16.mxu1 %v4480_v13 }
 0x776   : > { %4483 = vmatpush3.bf16.msra.mxu1 %v4480_v13 }
 0x777   : > { %4485 = vmatprep.subr.bf16.mxu1 %v4484_v16 }
 0x77a   : > { %4487 = vmatpush3.bf16.msra.mxu1 %v4484_v16 }
 0x840   : > { %v4405_v32 = vpop.f32.mrb[16].mxu1 }
 0x841   : > { %v2999_v34 = vadd.f32 %v4405_v32, %v5067_v30  ;;  %v2989_v35 = vpop.f32.mrb[17].mxu1 }
 0x842   : > { %v2998_v36 = vadd.f32 %v2989_v35, %v5062_v27 }
 0x843   : > { %v5239_v37 = vadd.f32 %v4188_v33, %v2999_v34 }
 0x844   : > { %v5241_v38 = vadd.f32 %v4188_v33, %v2998_v36 }
 0x845   : > { %v3014_v39 = vsel %vm1422_vm6, %v5239_v37, 0.0 }
 0x846   : > { %3015 = vadd.xlane.f32.xlu1 %v3014_v39  ;;  %v3011_v40 = vsel %vm1422_vm6, %v5241_v38, 0.0 }
 0x847   : > { %3012 = vadd.xlane.f32.xlu0 %v3011_v40 }
 0x8d3   : > { %v3016_v41 = vpop.xlane.xlu1 %3015 }
 0x8d4   : > { %v3018_v1 = vmul.f32 0.0625, %v3016_v41  ;;  %v3013_v30 = vpop.xlane.xlu0 %3012 }
 0x8d5   : > { %v3017_v42 = vmul.f32 0.0625, %v3013_v30 }
 0x8d6   : > { %v3020_v27 = vsub.f32 %v5239_v37, %v3018_v1 }
 0x8d7   : > { %v3019_v43 = vsub.f32 %v5241_v38, %v3017_v42 }
 0x8d8   : > { %v3022_v46 = vmul.f32 %v3020_v27, %v3020_v27 }
 0x8d9   : > { %v3021_v44 = vmul.f32 %v3019_v43, %v3019_v43 }
 0x8da   : > { %v3026_v47 = vsel %vm1422_vm6, %v3022_v46, 0.0 }
 0x8db   : > { %v3023_v45 = vsel %vm1422_vm6, %v3021_v44, 0.0 }
 0x8dc   : > { %3024 = vadd.xlane.f32.xlu0 %v3023_v45 }
 0x8e0   : > { %3027 = vadd.xlane.f32.xlu0 %v3026_v47 }
 0x969   : > { %v3025_v51 = vpop.xlane.xlu0 %3024 }
 0x96a   : > { %v3029_v52 = vmul.f32 0.0625, %v3025_v51 }
 0x96c   : > { %v3031_v53 = vadd.f32 1e-05, %v3029_v52 }
 0x96d   : > { %v3028_v54 = vpop.xlane.xlu0 %3027 }
 0x96e   : > { %4653 = vrsqrt.f32 %v3031_v53  ;;  %v3030_v55 = vmul.f32 0.0625, %v3028_v54 }
 0x970   : > { %v3032_v56 = vadd.f32 1e-05, %v3030_v55 }
 0x972   : > { %4655 = vrsqrt.f32 %v3032_v56 }
 0x978   : > { %v4654_v57 = vpop.eup %4653 }
 0x979   : > { %v3035_v59 = vmul.f32 %v4654_v57, %v3019_v43 }
 0x97b   : > { %v3043_v61 = vmul.f32 %v4189_v58, %v3035_v59 }
 0x97c   : > { %v4656_v62 = vpop.eup %4655 }
 0x97d   : > { %v3036_v63 = vmul.f32 %v4656_v62, %v3020_v27  ;;  %v3051_v3 = vadd.f32 %v4190_v60, %v3043_v61 }
 0x97f   : > { %v3044_v4 = vmul.f32 %v4189_v58, %v3036_v63  ;;  %4410 = vmatprep.mubr.msk.f32.mxu0 %vm1422_vm6, %v3051_v3 }
 0x981   : > { %v3052_v5 = vadd.f32 %v4190_v60, %v3044_v4 }
 0x983   : > { %4411 = vmatmul.mubr.msk.f32.vlgmr.msra.gmra.mrb[22].mxu0 %vm1422_vm6, %v3052_v5 }
 0xa56   : > { %v4412_v18 = vpop.f32.mrb[22].mxu0 }
 0xa57   : > { %v3140_v0 = vadd.f32 %v4412_v18, %v4191_v17  ;;  %v3134_v19 = vpop.f32.mrb[23].mxu0 }
 0xa58   : > { %v3135_v20 = vadd.f32 %v4191_v17, %v3134_v19 }
 0xa59   : > { %v3146_v21 = vmul.f32 0.70710677, %v3140_v0  ;;  %v3144_v8 = vmul.f32 0.5, %v3140_v0 }
 0xa5a   : > { %v3145_v22 = vmul.f32 0.70710677, %v3135_v20  ;;  %v3143_v6 = vmul.f32 0.5, %v3135_v20 }
 0xa5b   : > { %v3148_v23 = vand.u32 2147483647, %v3146_v21  ;;  %vm3188_vm10 = vcmp.lt.f32.partialorder %v3146_v21, 0.0 }
 0xa5c   : > { %v3147_v24 = vand.u32 2147483647, %v3145_v22  ;;  %vm3187_vm11 = vcmp.lt.f32.partialorder %v3145_v22, 0.0 }
 0xa5d   : > { %v3150_v25 = vmul.f32 0.3275911, %v3148_v23  ;;  %v3176_v31 = vsub.f32 0.0, %v3148_v23 }
 0xa5e   : > { %v3149_v26 = vmul.f32 0.3275911, %v3147_v24  ;;  %v3175_v32 = vsub.f32 0.0, %v3147_v24 }
 0xa5f   : > { %v3152_v28 = vadd.f32 1.0, %v3150_v25  ;;  %v3178_v34 = vmul.f32 %v3176_v31, %v3148_v23 }
 0xa60   : > { %v3151_v29 = vadd.f32 1.0, %v3149_v26  ;;  %v3177_v39 = vmul.f32 %v3175_v32, %v3147_v24 }
 0xa61   : > { %4657 = vrcp.f32 %v3152_v28  ;;  %v3181_v1 = vmul.f32 1.442695, %v3178_v34 }
 0xa62   : > { %4659 = vrcp.f32 %v3151_v29  ;;  %v3179_v27 = vmul.f32 1.442695, %v3177_v39 }
 0xa63   : > { %4661 = vpow2.f32 %v3181_v1 }
 0xa64   : > { %4663 = vpow2.f32 %v3179_v27 }
 0xa6b   : > { %v4658_v33 = vpop.eup %4657 }
 0xa6c   : > { %v4660_v35 = vpop.eup %4659  ;;  %v3158_v36 = vmul.f32 1.0614054, %v4658_v33 }
 0xa6d   : > { %v3157_v40 = vmul.f32 1.0614054, %v4660_v35  ;;  %v4662_v55 = vpop.eup %4661 }
 0xa6e   : > { %v3160_v41 = vadd.f32 -1.4531521, %v3158_v36  ;;  %v4664_v57 = vpop.eup %4663 }
 0xa6f   : > { %v3159_v30 = vadd.f32 -1.4531521, %v3157_v40  ;;  %v4198_v40 = vld [vmem:[%s1216_s3] ss:$0 sm:$0xff]  ;;  %s5490_s3 = sld [smem:[#allocation26_spill]] (!%p4199_p11) }
 0xa70   : > { %v3162_v42 = vmul.f32 %v4658_v33, %v3160_v41 }
 0xa71   : > { %v3161_v43 = vmul.f32 %v4660_v35, %v3159_v30 }
 0xa72   : > { %v3164_v44 = vadd.f32 1.4214138, %v3162_v42 }
 0xa73   : > { %v3163_v45 = vadd.f32 1.4214138, %v3161_v43 }
 0xa74   : > { %v3166_v46 = vmul.f32 %v4658_v33, %v3164_v44 }
 0xa75   : > { %v3165_v47 = vmul.f32 %v4660_v35, %v3163_v45 }
 0xa76   : > { %v3168_v48 = vadd.f32 -0.28449672, %v3166_v46 }
 0xa77   : > { %v3167_v49 = vadd.f32 -0.28449672, %v3165_v47 }
 0xa78   : > { %v3170_v50 = vmul.f32 %v4658_v33, %v3168_v48  ;;  %v3359_v48 = vld [vmem:[%s5487_s5] sm:$0xff] (!%p4199_p11) }
 0xa79   : > { %v3169_v51 = vmul.f32 %v4660_v35, %v3167_v49  ;;  %v3360_v49 = vld [vmem:[%s5487_s5 + $0x8] sm:$0xff] (!%p4199_p11) }
 0xa7a   : > { %v3172_v52 = vadd.f32 0.2548296, %v3170_v50  ;;  %v3444_v50 = vld [vmem:[%s5488_s13] sm:$0xff] (!%p4199_p11) }
 0xa7b   : > { %v3171_v53 = vadd.f32 0.2548296, %v3169_v51  ;;  %v4826_v51 = vmov (!%p4199_p11), 0.0|0.0  }
 0xa7c   : > { %v3174_v54 = vmul.f32 %v4658_v33, %v3172_v52  ;;  %4488 = vmatprep.subr.bf16.mxu0 (!%p4199_p11), %v4826_v51  ;;  %v4489_v52 = vpack.c.bf16 (!%p4199_p11), %v3360_v49, %v3359_v48 }
 0xa7d   : > { %v3173_v56 = vmul.f32 %v4660_v35, %v3171_v53  ;;  %v4197_v35 = vld [vmem:[%s1213_s14] ss:$0 sm:$0xff]  ;;  %s5489_s14 = sld [smem:[#allocation11_spill]] (!%p4199_p11)  ;;  %v3445_v53 = vld [vmem:[%s5488_s13 + $0x8] sm:$0xff] (!%p4199_p11) }
 0xa7e   : > { %v3184_v58 = vmul.f32 %v4662_v55, %v3174_v54  ;;  %v4828_v54 = vmov (!%p4199_p11), 0.0   ;;  %v4491_v55 = vpack.c.bf16 (!%p4199_p11), %v3445_v53, %v3444_v50  ;;  %4490 = vmatpush3.bf16.msra.mxu0 (!%p4199_p11), %v4489_v52 }
 0xa7f   : > { %v3183_v59 = vmul.f32 %v4664_v57, %v3173_v56  ;;  %4436 = vmatprep.mubr.msk.f32.mxu0 (!%p4199_p11), %vm4827_vm14, %v4828_v54  ;;  %v4200_v57 = vld [vmem:[%s5490_s3] ss:$0 sm:$0xff] (!%p4199_p11) }
 0xa80   : > { %v3186_v60 = vsub.f32 1.0, %v3184_v58  ;;  %4492 = vmatprep.subr.bf16.mxu1 (!%p4199_p11), %v4491_v55 }
 0xa81   : > { %v3185_v61 = vsub.f32 1.0, %v3183_v59  ;;  %v4202_v59 = vld [vmem:[%s5491_s26] ss:$0 sm:$0xff] (!%p4199_p11) }
 0xa82   : > { %v3190_v62 = vsub.f32 0.0, %v3186_v60 }
 0xa83   : > { %v3189_v63 = vsub.f32 0.0, %v3185_v61  ;;  %v3441_v56 = vld [vmem:[%s5489_s14] sm:$0x3] (!%p4199_p11) }
 0xa84   : > { %v3192_v3 = vsel %vm3188_vm10, %v3190_v62, %v3186_v60  ;;  %vm3442_vm15 = vcmp.ne.s32.totalorder (!%p4199_p11), %v3441_v56, 0  ;;  %v3533_v60 = vld [vmem:[%s5492_s8] sm:$0xff] (!%p4199_p11)  ;;  %vm3678_vm10 = vcmask (!%p4199_p11), 23552  }
 0xa85   : > { %v3194_v4 = vadd.f32 1.0, %v3192_v3  ;;  %v3191_v5 = vsel %vm3187_vm11, %v3189_v63, %v3185_v61  ;;  %vm3535_vm1 = vcmp.ne.s32.totalorder (!%p4199_p11), %v3533_v60, 0  ;;  %vm3675_vm11 = vcmask (!%p4199_p11), 39936  }
 0xa86   : > { %v3193_v7 = vadd.f32 1.0, %v3191_v5 }
 0xa87   : > { %v3196_v2 = vmul.f32 %v3194_v4, %v3144_v8 }
 0xa88   : > { %v3195_v9 = vmul.f32 %v3193_v7, %v3143_v6 }
 0xa8a   : > { %4429 = vmatprep.mubr.msk.f32.mxu1 %vm3205_vm12, %v3195_v9 }
 0xa8b   : > { %4430 = vmatmul.mubr.msk.f32.vlgmr.msra.gmra.mrb[18].mxu1 %vm3205_vm12, %v3196_v2 }
 0xa8c   : > { %4494 = vmatpush3.bf16.msra.mxu1 (!%p4199_p11), %v4491_v55 }
 0xb5e   : > { %v4431_v10 = vpop.f32.mrb[18].mxu1 }
 0xb5f   : > { %v3288_v12 = vadd.f32 %v4431_v10, %v5239_v37  ;;  %v3278_v13 = vpop.f32.mrb[19].mxu1 }
 0xb60   : > { %v3287_v14 = vadd.f32 %v3278_v13, %v5241_v38 }
 0xb61   : > { %v3297_v15 = vadd.f32 %v4196_v11, %v3288_v12 }
 0xb62   : > { %v3296_v16 = vadd.f32 %v4196_v11, %v3287_v14 }
 0xb63   : > { %v3303_v17 = vsel %vm1422_vm6, %v3297_v15, 0.0 }
 0xb64   : > { %3304 = vadd.xlane.f32.xlu1 %v3303_v17  ;;  %v3300_v18 = vsel %vm1422_vm6, %v3296_v16, 0.0 }
 0xb65   : > { %3301 = vadd.xlane.f32.xlu0 %v3300_v18 }
 0xbf1   : > { %v3305_v0 = vpop.xlane.xlu1 %3304 }
 0xbf2   : > { %v3307_v19 = vmul.f32 0.0625, %v3305_v0  ;;  %v3302_v20 = vpop.xlane.xlu0 %3301 }
 0xbf3   : > { %v3306_v21 = vmul.f32 0.0625, %v3302_v20 }
 0xbf4   : > { %v3309_v22 = vsub.f32 %v3297_v15, %v3307_v19 }
 0xbf5   : > { %v3308_v23 = vsub.f32 %v3296_v16, %v3306_v21 }
 0xbf6   : > { %v3311_v24 = vmul.f32 %v3309_v22, %v3309_v22 }
 0xbf7   : > { %v3310_v37 = vmul.f32 %v3308_v23, %v3308_v23 }
 0xbf8   : > { %v3315_v38 = vsel %vm1422_vm6, %v3311_v24, 0.0 }
 0xbf9   : > { %3316 = vadd.xlane.f32.xlu1 %v3315_v38  ;;  %v3312_v25 = vsel %vm1422_vm6, %v3310_v37, 0.0 }
 0xbfa   : > { %3313 = vadd.xlane.f32.xlu0 %v3312_v25 }
 0xc86   : > { %v3317_v26 = vpop.xlane.xlu1 %3316 }
 0xc87   : > { %v3319_v28 = vmul.f32 0.0625, %v3317_v26  ;;  %v3314_v29 = vpop.xlane.xlu0 %3313  ;;  %v3534_v26 = vld [vmem:[%s5492_s8 + $0x8] sm:$0x3f] (!%p4199_p11) }
 0xc88   : > { %v3318_v31 = vmul.f32 0.0625, %v3314_v29  ;;  %vm3536_vm5 = vcmp.ne.s32.totalorder (!%p4199_p11), %v3534_v26, 0 }
 0xc89   : > { %v3321_v32 = vadd.f32 1e-05, %v3319_v28 }
 0xc8a   : > { %v3320_v33 = vadd.f32 1e-05, %v3318_v31 }
 0xc8b   : > { %4665 = vrsqrt.f32 %v3321_v32 }
 0xc8c   : > { %4667 = vrsqrt.f32 %v3320_v33 }
 0xc95   : > { %v4666_v34 = vpop.eup %4665 }
 0xc96   : > { %v4668_v36 = vpop.eup %4667  ;;  %v3325_v39 = vmul.f32 %v4666_v34, %v3309_v22 }
 0xc97   : > { %v3324_v41 = vmul.f32 %v4668_v36, %v3308_v23 }
 0xc98   : > { %v3333_v1 = vmul.f32 %v4197_v35, %v3325_v39 }
 0xc99   : > { %v3332_v30 = vmul.f32 %v4197_v35, %v3324_v41  ;;  %3358 = sbr.rel (%p4199_p11) target bundleno = 4251 (0x109b), region = 136 }
 0xc9a   : > { %v3341_v42 = vadd.f32 %v4198_v40, %v3333_v1 }
 0xc9b   : > { %v3340_v27 = vadd.f32 %v4198_v40, %v3332_v30 }
 0xc9c   : > { %3343 = vst.msk [vmem:[%s5280_s11 + $0x8] sm:$0xff] %vm1422_vm6, %v3341_v42  ;;  %v3345_v43 = vrot.slane %v3341_v42, 7  ;;  %v3351_v44 = vrot.slane %v3341_v42, 2 }
 0xc9d   : > { %3342 = vst.msk [vmem:[%s5280_s11] sm:$0xff] %vm1422_vm6, %v3340_v27  ;;  %v3349_v45 = vrot.slane %v3340_v27, 1 }
 0xc9e   : > { %v5287_v46 = vsel %vm1417_vm4, %v3340_v27, %v3345_v43 }
 0xc9f   : > { %v3354_v47 = vsel %vm3353_vm13, %v3349_v45, %v3351_v44  ;;  %4437 = vmatmul.mubr.msk.f32.vlgmr.msra.gmra.mrb[0].mxu0 (!%p4199_p11), %vm1422_vm6, %v5287_v46 }
 0xca0   : > { %4443 = vmatprep.mubr.msk.f32.mxu1 %vm1422_vm6, %v3354_v47 }
 0xca1   : > { %4444 = vmatmul.mubr.msk.f32.vlgmr.msra.gmra.mrb[0].mxu1 %vm1422_vm6, %v3351_v44 }
 0xd72   : > { %v3437_v58 = vpop.f32.mrb[0].mxu0 }
 0xd73   : > { %v3438_v61 = vadd.f32 %v4200_v57, %v3437_v58  ;;  %v4438_v62 = vpop.f32.mrb[1].mxu0 }
 0xd74   : > { %v4445_v63 = vpop.f32.mrb[0].mxu1 }
 0xd75   : > { %v5307_v3 = vsel %vm3442_vm15, %v3438_v61, -1e+30  ;;  %v5309_v4 = vadd.f32 %v4445_v63, %v4202_v59  ;;  %v3524_v5 = vpop.f32.mrb[1].mxu1 }
 0xd76   : > { %v5311_v6 = vadd.f32 %v4202_v59, %v3524_v5  ;;  %v3540_v7 = vsel %vm3539_vm0, %v5307_v3, -inf  ;;  %v3599_v2 = vsel %vm3598_vm3, %v5307_v3, -inf }
 0xd77   : > { %3541 = vmax.xlane.f32.xlu0 %v3540_v7  ;;  %v5329_v32 = vsel %vm3536_vm5, %v5309_v4, -1e+30 }
 0xd78   : > { %v5316_v8 = vsel %vm3535_vm1, %v5311_v6, -1e+30  ;;  %v3612_v35 = vsel %vm3611_vm9, %v5329_v32, -inf }
 0xd79   : > { %v3551_v9 = vsel %vm3550_vm2, %v5316_v8, -inf  ;;  %v3610_v34 = vsel %vm3609_vm8, %v5316_v8, -inf }
 0xd7a   : > { %v3613_v36 = vmax.f32 %v3610_v34, %v3612_v35 }
 0xd7b   : > { %3552 = vmax.xlane.f32.xlu0 %v3551_v9 }
 0xd7f   : > { %3600 = vmax.xlane.f32.xlu0 %v3599_v2 }
 0xe04   : > { %v3542_v10 = vpop.xlane.xlu0 %3541 }
 0xe05   : > { %v3543_v11 = vrot.slane %v3542_v10, 4 }
 0xe07   : > { %v3544_v12 = vmax.f32 %v3542_v10, %v3543_v11 }
 0xe08   : > { %v3553_v13 = vpop.xlane.xlu0 %3552 }
 0xe09   : > { %v3545_v14 = vrot.slane %v3544_v12, 2  ;;  %v3554_v15 = vrot.slane %v3553_v13, 4 }
 0xe0b   : > { %v3555_v16 = vmax.f32 %v3553_v13, %v3554_v15  ;;  %v3546_v17 = vmax.f32 %v3544_v12, %v3545_v14 }
 0xe0c   : > { %v3601_v51 = vpop.xlane.xlu0 %3600 }
 0xe0d   : > { %v3556_v18 = vrot.slane %v3555_v16, 2  ;;  %v3547_v0 = vrot.slane %v3546_v17, 1  ;;  %v3602_v53 = vrot.slane %v3601_v51, 4 }
 0xe0f   : > { %v3548_v19 = vmax.f32 %v3546_v17, %v3547_v0  ;;  %v3557_v20 = vmax.f32 %v3555_v16, %v3556_v18  ;;  %v3603_v55 = vmax.f32 %v3601_v51, %v3602_v53 }
 0xe11   : > { %4499 = vpush %v3548_v19  ;;  %v3558_v21 = vrot.slane %v3557_v20, 1  ;;  %v3604_v58 = vrot.slane %v3603_v55, 2 }
 0xe13   : > { %v3559_v22 = vmax.f32 %v3557_v20, %v3558_v21  ;;  %v3605_v60 = vmax.f32 %v3603_v55, %v3604_v58 }
 0xe15   : > { %4501 = vpush %v3559_v22  ;;  %v3606_v62 = vrot.slane %v3605_v60, 1 }
 0xe17   : > { %v3607_v9 = vmax.f32 %v3605_v60, %v3606_v62 }
 0xe42   : > { %s4500_s14 = spop %4499 }
 0xe46   : > { %s4502_s3 = spop %4501 }
 0xe47   : > { %s5321_s26 = smax.f32 %s4502_s3, %s4500_s14 }
 0xe48   : > { %v3562_v23 = vstv %s5321_s26 }
 0xe49   : > { %v3563_v24 = vsub.f32 %v5307_v3, %v3562_v23  ;;  %v3576_v37 = vsub.f32 %v5316_v8, %v3562_v23 }
 0xe4b   : > { %v3564_v38 = vmul.f32 1.442695, %v3563_v24  ;;  %v3577_v25 = vmul.f32 1.442695, %v3576_v37 }
 0xe4d   : > { %4669 = vpow2.f32 %v3564_v38 }
 0xe4e   : > { %4671 = vpow2.f32 %v3577_v25 }
 0xe57   : > { %v4670_v28 = vpop.eup %4669 }
 0xe58   : > { %v3566_v29 = vsel %vm3539_vm0, %v4670_v28, 0.0  ;;  %v4672_v31 = vpop.eup %4671 }
 0xe59   : > { %3567 = vadd.xlane.f32.xlu1 %v3566_v29  ;;  %v3579_v33 = vsel %vm3550_vm2, %v4672_v31, 0.0 }
 0xe5d   : > { %3580 = vadd.xlane.f32.xlu1 %v3579_v33 }
 0xe61   : > { %3614 = vmax.xlane.f32.xlu1 %v3613_v36 }
 0xee6   : > { %v3568_v39 = vpop.xlane.xlu1 %3567 }
 0xee7   : > { %v3569_v40 = vrot.slane %v3568_v39, 4 }
 0xee9   : > { %v3570_v41 = vadd.f32 %v3569_v40, %v3568_v39 }
 0xeea   : > { %v3581_v1 = vpop.xlane.xlu1 %3580 }
 0xeeb   : > { %v3571_v30 = vrot.slane %v3570_v41, 2  ;;  %v3582_v42 = vrot.slane %v3581_v1, 4 }
 0xeed   : > { %v3583_v27 = vadd.f32 %v3582_v42, %v3581_v1  ;;  %v3572_v43 = vadd.f32 %v3571_v30, %v3570_v41 }
 0xeee   : > { %v3615_v52 = vpop.xlane.xlu1 %3614 }
 0xeef   : > { %v3584_v44 = vrot.slane %v3583_v27, 2  ;;  %v3573_v45 = vrot.slane %v3572_v43, 1  ;;  %v3616_v54 = vrot.slane %v3615_v52, 4 }
 0xef1   : > { %v3574_v47 = vadd.f32 %v3573_v45, %v3572_v43  ;;  %v3585_v48 = vadd.f32 %v3584_v44, %v3583_v27  ;;  %v3617_v56 = vmax.f32 %v3615_v52, %v3616_v54 }
 0xef3   : > { %4503 = vpush %v3574_v47  ;;  %v3586_v49 = vrot.slane %v3585_v48, 1  ;;  %v3618_v59 = vrot.slane %v3617_v56, 2 }
 0xef5   : > { %v3587_v50 = vadd.f32 %v3586_v49, %v3585_v48  ;;  %v3619_v61 = vmax.f32 %v3617_v56, %v3618_v59 }
 0xef7   : > { %4505 = vpush %v3587_v50  ;;  %v3620_v63 = vrot.slane %v3619_v61, 1 }
 0xef9   : > { %v3621_v2 = vmax.f32 %v3619_v61, %v3620_v63 }
 0xf24   : > { %s4504_s14 = spop %4503 }
 0xf28   : > { %s4506_s3 = spop %4505 }
 0xf29   : > { %s3589_s5 = sadd.f32 %s4506_s3, %s4504_s14 }
 0xf2b   : > { %v3590_v57 = vstv %s3589_s5 }
 0xf2c   : > { %4673 = vlog2.f32 %v3590_v57 }
 0xf36   : > { %v4674_v5 = vpop.eup %4673 }
 0xf37   : > { %v3592_v7 = vmul.f32 0.6931472, %v4674_v5 }
 0xf39   : > { %4507 = vpush %v3592_v7 }
 0xf3a   : > { %4509 = vpush %v3607_v9 }
 0xf3b   : > { %4511 = vpush %v3621_v2 }
 0xf6a   : > { %s5334_s6 = spop %4507 }
 0xf6b   : > { %s4510_s8 = spop %4509  ;;  %s3594_s3 = sadd.f32 %s5334_s6, %s5321_s26 }
 0xf6c   : > { %s4512_s12 = spop %4511 }
 0xf6d   : > { %s5336_s14 = smax.f32 %s4512_s12, %s4510_s8  ;;  %v3595_v27 = vstv %s3594_s3 }
 0xf6e   : > { %v3624_v10 = vstv %s5336_s14  ;;  %v3596_v43 = vsub.f32 %v5307_v3, %v3595_v27  ;;  %v3597_v44 = vsub.f32 %v5316_v8, %v3595_v27 }
 0xf6f   : > { %v3625_v11 = vsub.f32 %v5307_v3, %v3624_v10  ;;  %v3641_v12 = vsub.f32 %v5316_v8, %v3624_v10  ;;  %v3642_v13 = vsub.f32 %v5329_v32, %v3624_v10 }
 0xf71   : > { %v3626_v14 = vmul.f32 1.442695, %v3625_v11  ;;  %v3643_v15 = vmul.f32 1.442695, %v3641_v12  ;;  %v3645_v16 = vmul.f32 1.442695, %v3642_v13 }
 0xf73   : > { %4675 = vpow2.f32 %v3626_v14 }
 0xf74   : > { %4677 = vpow2.f32 %v3643_v15 }
 0xf75   : > { %4679 = vpow2.f32 %v3645_v16 }
 0xf7d   : > { %v4676_v17 = vpop.eup %4675 }
 0xf7e   : > { %v4678_v18 = vpop.eup %4677  ;;  %v3629_v0 = vrot.slane %v4676_v17, 1 }
 0xf7f   : > { %v4680_v19 = vpop.eup %4679  ;;  %v3649_v20 = vrot.slane %v4678_v18, 7 }
 0xf80   : > { %v3631_v21 = vsel %vm3539_vm0, %v3629_v0, 0.0  ;;  %v3650_v22 = vrot.slane %v4680_v19, 7 }
 0xf81   : > { %3632 = vadd.xlane.f32.xlu0 %v3631_v21 }
 0xf82   : > { %v3651_v23 = vsel %vm1417_vm4, %v3649_v20, %v3650_v22 }
 0xf83   : > { %v3653_v24 = vsel %vm3550_vm2, %v3651_v23, 0.0 }
 0xf84   : > { %3654 = vadd.xlane.f32.xlu1 %v3653_v24 }
0x100e   : > { %v3633_v37 = vpop.xlane.xlu0 %3632 }
0x100f   : > { %v3634_v38 = vrot.slane %v3633_v37, 4 }
0x1011   : > { %v3635_v25 = vadd.f32 %v3634_v38, %v3633_v37  ;;  %v3655_v26 = vpop.xlane.xlu1 %3654 }
0x1012   : > { %v3656_v28 = vrot.slane %v3655_v26, 4 }
0x1013   : > { %v3636_v29 = vrot.slane %v3635_v25, 2 }
0x1014   : > { %v3657_v31 = vadd.f32 %v3656_v28, %v3655_v26 }
0x1015   : > { %v3637_v33 = vadd.f32 %v3636_v29, %v3635_v25 }
0x1016   : > { %v3658_v34 = vrot.slane %v3657_v31, 2 }
0x1017   : > { %v3638_v35 = vrot.slane %v3637_v33, 1 }
0x1018   : > { %v3659_v36 = vadd.f32 %v3658_v34, %v3657_v31 }
0x1019   : > { %v3639_v39 = vadd.f32 %v3638_v35, %v3637_v33 }
0x101a   : > { %v3660_v40 = vrot.slane %v3659_v36, 1 }
0x101b   : > { %4513 = vpush %v3639_v39 }
0x101c   : > { %v3661_v41 = vadd.f32 %v3660_v40, %v3659_v36 }
0x101e   : > { %4515 = vpush %v3661_v41 }
0x104c   : > { %s4514_s12 = spop %4513 }
0x104f   : > { %s4516_s5 = spop %4515 }
0x1050   : > { %s3663_s8 = sadd.f32 %s4516_s5, %s4514_s12 }
0x1052   : > { %v3664_v1 = vstv %s3663_s8 }
0x1053   : > { %4681 = vlog2.f32 %v3664_v1 }
0x105d   : > { %v4682_v30 = vpop.eup %4681 }
0x105e   : > { %v3666_v42 = vmul.f32 0.6931472, %v4682_v30 }
0x1060   : > { %4517 = vpush %v3666_v42 }
0x1091   : > { %s4518_s13 = spop %4517 }
0x1092   : > { %s3668_s17 = sadd.f32 %s4518_s13, %s5336_s14 }
0x1094   : > { %v3669_v45 = vstv %s3668_s17 }
0x1095   : > { %v3670_v47 = vsub.f32 %v5307_v3, %v3669_v45  ;;  %v3671_v48 = vsub.f32 %v5316_v8, %v3669_v45  ;;  %v3672_v49 = vsub.f32 %v5329_v32, %v3669_v45 }
0x1097   : > { %v3673_v50 = vsel %vm1417_vm4, %v3596_v43, %v3670_v47  ;;  %v3674_v51 = vsel %vm3353_vm13, %v3597_v44, %v3671_v48  ;;  %v3680_v52 = vsel %vm3678_vm10, %v3672_v49, %v5309_v4 }
0x1098   : > { %v3676_v53 = vsel %vm3675_vm11, %v3673_v50, 0.0  ;;  %v3679_v54 = vsel %vm3678_vm10, %v3674_v51, %v5311_v6  ;;  %v3682_v55 = vsel %vm1559_vm7, %v3680_v52, 0.0 }
0x1099   : > { %3677 = vst [vmem:[%s5292_s7] sm:$0x3] %v3676_v53  ;;  %v3681_v56 = vsel %vm1559_vm7, %v3679_v54, 0.0  ;;  %3684 = vst [vmem:[%s5082_s1 + $0x8] sm:$0x3f] %v3682_v55 }
0x109a   : > { %3683 = vst [vmem:[%s5082_s1] sm:$0xff] %v3681_v56 }
0x109b PF: > { %p4205_p12 = scmp.eq.s32.totalorder %s5014_s0, 0 }
0x109c   : > { %s5493_s17 = sld [smem:[#allocation29_spill]] (!%p4205_p12)  ;;  %v4829_v8 = vmov (!%p4205_p12), 0.0|0.0   ;;  %vm4830_vm4 = vmmov (!%p4205_p12), 0   ;;  %v4831_v32 = vmov (!%p4205_p12), 0.0   ;;  %v4206_v57 = vld [vmem:[#allocation2] ss:$0 sm:$0xff] (!%p4205_p12) }
0x109d   : > { %3688 = sbr.rel (%p4205_p12) target bundleno = 4480 (0x1180), region = 140  ;;  %4495 = vmatprep.subr.bf16.mxu0 (!%p4205_p12), %v4829_v8  ;;  %4450 = vmatprep.mubr.msk.f32.mxu0 (!%p4205_p12), %vm4830_vm4, %v4831_v32  ;;  %3774 = vst [vmem:[%s5082_s1] sm:$0xff] (!%p4205_p12), %v4831_v32  ;;  %3775 = vst [vmem:[%s5082_s1 + $0x8] sm:$0x3f] (!%p4205_p12), %v4831_v32  ;;  %vm3771_vm7 = vcmask (!%p4205_p12), 7168  }
0x10a2   : > { %v3689_v3 = vld [vmem:[%s5493_s17] sm:$0xff] (!%p4205_p12)  ;;  %v3690_v4 = vld [vmem:[%s5493_s17 + $0x8] sm:$0xff] (!%p4205_p12) }
0x10a3   : > { %v4496_v6 = vpack.c.bf16 (!%p4205_p12), %v3690_v4, %v3689_v3 }
0x10a5   : > { %4497 = vmatpush3.bf16.msra.mxu0 %v4496_v6 }
0x10a8   : > { %4451 = vmatmul.mubr.msk.f32.vlgmr.msra.gmra.mrb[0].mxu0 %vm1422_vm6, %v5287_v46 }
0x117b   : > { %v3767_v58 = vpop.f32.mrb[0].mxu0 }
0x117c   : > { %v3768_v59 = vadd.f32 %v4206_v57, %v3767_v58  ;;  %v4452_v60 = vpop.f32.mrb[1].mxu0 }
0x117e   : > { %v3772_v61 = vsel %vm3771_vm7, %v3768_v59, 0.0 }
0x117f   : > { %3773 = vst [vmem:[%s5292_s7] sm:$0x3] %v3772_v61 }
0x1180 PF: > { %s4220_s6 = sshll.u32 %s5014_s0, 8  ;;  %s3800_s1 = sshll.u32 %s5280_s11, 4  ;;  %s5375_s1 = int_to_ptr.vmem [resolvable:$true] %s3800_s1 }
0x1181   : > { %s5372_s13 = scalar_lea.hbm %s5469_s20, %s4220_s6  ;;  %s3777_s26 = scalar_lea.sflag [#allocation4], %s5272_s9 }
0x1182   : > { %s4683_s14 = scalar_lea.vmem %s5375_s1, 256  ;;  %s4832_s12 = smov [#allocation3]  }
0x1183   : > { %p4684_p13 = scmp.ne.s32.totalorder %s5375_s1, %s4683_s14  ;;  %s4687_s5 = sshll.u32 %s4832_s12, 4  ;;  %s4688_s5 = int_to_ptr.vmem [resolvable:$false] %s4687_s5 }
0x1184   : > { %s4689_s8 = scalar_lea.vmem %s4688_s5, 512  ;;  %p4690_p2 = scmp.lt.s32.totalorder %s5375_s1, %s4688_s5 }
0x1185   : > { %p4685_p0 = pnand %p4684_p13, %p5031_p5  ;;  %p4691_p3 = scmp.lt.s32.totalorder %s4689_s8, %s4683_s14 }
0x1187   : > { %p4686_p1 = pneg %p4685_p0  ;;  %p4692_p4 = por %p4691_p3, %p4690_p2 }
0x1189   : > { %p4693_p7 = pnand %p4692_p4, %p4686_p1 }
0x118b   : > { %4696 = shalt.err (!%p4693_p7)
}
0x118c   : > { %s4697_s11 = scalar_lea.hbm %s5372_s13, 256  ;;  %s4701_s3 = scalar_lea.hbm %s5469_s20, 512 }
0x118d   : > { %p4698_p8 = scmp.ne.s32.totalorder %s5372_s13, %s4697_s11  ;;  %p4702_p11 = scmp.lt.u32.totalorder %s5372_s13, %s5469_s20 }
0x118e   : > { %p4703_p12 = scmp.lt.u32.totalorder %s4701_s3, %s4697_s11  ;;  %p4705_p0 = scmp.lt.u32.totalorder %s4697_s11, %s5372_s13 }
0x118f   : > { %p4699_p9 = pnand %p4698_p8, %p5031_p5 }
0x1190   : > { %p4704_p13 = por %p4703_p12, %p4702_p11 }
0x1191   : > { %p4700_p10 = pneg %p4699_p9 }
0x1192   : > { %p4706_p2 = por %p4705_p0, %p4704_p13 }
0x1194   : > { %p4707_p1 = pnand %p4706_p2, %p4700_p10 }
0x1196   : > { %4710 = shalt.err (!%p4707_p1)
}
0x1197   : > { %s4833_s6 = smov 128   ;;  %s5494_s14 = smov 8  }
0x1198   : > { %4519 = dma.vmem_to_hbm [thread:$0]  (%p5031_p5), %s5375_s1, 256, %s5372_s13, %s3777_s26, %s4833_s6, %s4833_s6, %s5494_s14  }
0x1199   : > { %s4212_s12 = sshll.u32 %s5014_s0, 5  ;;  %s3816_s8 = sshll.u32 %s5292_s7, 4  ;;  %s3817_s8 = int_to_ptr.vmem [resolvable:$true] %s3816_s8 }
0x119a   : > { %s5400_s5 = scalar_lea.hbm %s4986_s4, %s4212_s12  ;;  %s3782_s11 = scalar_lea.sflag [#allocation6], %s5272_s9 }
0x119b   : > { %s4711_s3 = scalar_lea.vmem %s3817_s8, 32  ;;  %s4834_s17 = smov [#allocation5]  }
0x119c   : > { %p4712_p3 = scmp.ne.s32.totalorder %s3817_s8, %s4711_s3  ;;  %s4715_s19 = sshll.u32 %s4834_s17, 4  ;;  %s4716_s19 = int_to_ptr.vmem [resolvable:$false] %s4715_s19 }
0x119d   : > { %s4717_s20 = scalar_lea.vmem %s4716_s19, 64  ;;  %p4718_p8 = scmp.lt.s32.totalorder %s3817_s8, %s4716_s19 }
0x119e   : > { %p4713_p4 = pnand %p4712_p3, %p5031_p5  ;;  %p4719_p9 = scmp.lt.s32.totalorder %s4717_s20, %s4711_s3 }
0x11a0   : > { %p4714_p7 = pneg %p4713_p4  ;;  %p4720_p10 = por %p4719_p9, %p4718_p8 }
0x11a2   : > { %p4721_p11 = pnand %p4720_p10, %p4714_p7 }
0x11a4   : > { %4724 = shalt.err (!%p4721_p11)
}
0x11a5   : > { %s4725_s0 = scalar_lea.hbm %s5400_s5, 32  ;;  %s4729_s9 = scalar_lea.hbm %s4986_s4, 64 }
0x11a6   : > { %p4726_p12 = scmp.ne.s32.totalorder %s5400_s5, %s4725_s0  ;;  %p4730_p2 = scmp.lt.u32.totalorder %s5400_s5, %s4986_s4 }
0x11a7   : > { %p4731_p1 = scmp.lt.u32.totalorder %s4729_s9, %s4725_s0  ;;  %p4733_p4 = scmp.lt.u32.totalorder %s4725_s0, %s5400_s5 }
0x11a8   : > { %p4727_p13 = pnand %p4726_p12, %p5031_p5 }
0x11a9   : > { %p4732_p3 = por %p4731_p1, %p4730_p2 }
0x11aa   : > { %p4728_p0 = pneg %p4727_p13 }
0x11ab   : > { %p4734_p8 = por %p4733_p4, %p4732_p3 }
0x11ad   : > { %p4735_p7 = pnand %p4734_p8, %p4728_p0 }
0x11af   : > { %4738 = shalt.err (!%p4735_p7)
}
0x11b0   : > { %4520 = dma.vmem_to_hbm [thread:$0]  (%p5031_p5), %s3817_s8, 32, %s5400_s5, %s3782_s11  }
0x11b1 PF: > { %p4530_p9 = scmp.ge.s32.totalorder %s4777_s23, 2  ;;  %s3831_s19 = sand.u32 1, %s4765_s15  }
0x11b2   : > { %s3832_s20 = scalar_lea.sflag [#allocation4], %s3831_s19 }
0x11b3   : > { %p4524_p10 = pnand %p4530_p9, %p5035_p6 }
0x11b5   : > { %4756 = dma.done.wait (!%p4524_p10), %s3832_s20, 256  }
0x11b6   : > { %4758 = vsyncadd (!%p4524_p10), %s3832_s20, 4294967040  ;;  %s3841_s7 = scalar_lea.sflag [#allocation6], %s3831_s19 }
0x11b7   : > { %4760 = dma.done.wait (!%p4524_p10), %s3841_s7, 32  }
0x11b8   : > { %4762 = vsyncadd (!%p4524_p10), %s3841_s7, 4294967264  ;;  %p77_p5 = scmp.ge.s32.totalorder %s5018_s22, 4   ;;  %s5495_s15 = smov %s4769_s16 }
0x11b9   : > { %s5496_s16 = smov %s4773_s18  ;;  %s5497_s18 = smov %s5029_s28 }
0x11ba   : > { %s5498_s23 = smov %s5018_s22  ;;  %79 = sbr.rel (!%p77_p5) target bundleno = 66 (0x42), region = 285 }
0x11c1   :  { %3854 = vsyncpa [#allocation4], 1 }
0x11c2   :  { %3856 = vsyncpa [#allocation4 + $0x1], 1 }
0x11c3   :  { %3857 = vsyncpa [#allocation6], 1 }
0x11c4   :  { %3859 = vsyncpa [#allocation6 + $0x1], 1 }

</bundles_post_ra>
